<compile_context>
chip_gen: v7x
topology: tpu7x:2x2x1
jax: 0.10.0
libtpu: 0.0.40
codegen_flags: <defaults>
</compile_context>

<pallas_src>
import functools

import jax
import jax.numpy as jnp
from jax import lax
from jax.experimental import pallas as pl
from jax.experimental.pallas import tpu as pltpu


def _round_up(x, m):
    return (x + m - 1) // m * m


def _vmem_capacity_bytes():
    """Physical VMEM of the current generation (conservative fallback: v7x 64 MiB)."""
    try:
        info = pltpu.get_tpu_info()
        cap = getattr(info, "vmem_capacity_bytes", 0)
        if cap:
            return int(cap)
    except Exception:
        pass
    return 64 << 20


# -----------------------------------------------------------------------------
# VMEM working-set estimate for one conv band (counts DMA buffers, the two
# kx-shifted band copies, weights (double-buffered), f32 accumulator, the
# narrowed f32 result and the double-buffered output block).
# -----------------------------------------------------------------------------
def _conv_vmem_bytes(th, wp, wo, cin_p, cout_p, in_bytes=2, out_bytes=2):
    band = (th + 3) * wp * cin_p * in_bytes
    band_scratch = 2 * band                        # manual double-buffered DMA landing
    shifted_copies = 2 * band                      # kx=1,2 shifted copies of the band
    weights = 2 * 9 * cin_p * cout_p * in_bytes
    acc = th * wp * cout_p * 4
    res = th * wo * cout_p * 4
    out_blocks = 2 * th * wo * cout_p * out_bytes
    stats = 4 * 2 * cout_p * 4
    return band_scratch + shifted_copies + weights + acc + res + out_blocks + stats


def _pick_block_h(H, wp, wo, cin_p, cout_p, budget_bytes):
    best = 1
    for th in range(1, H + 1):
        if H % th == 0 and _conv_vmem_bytes(th, wp, wo, cin_p, cout_p) <= budget_bytes:
            best = th
    return best


def _pick_rows(total_rows, cout_p, budget_bytes=8 << 20):
    """Largest multiple-of-8 divisor of total_rows whose block fits the budget."""
    cap = max(8, (budget_bytes // (cout_p * 20)) // 8 * 8)
    if total_rows <= cap:
        return total_rows
    for t in range(cap, 7, -8):
        if total_rows % t == 0:
            return t
    return 8


# -----------------------------------------------------------------------------
# Kernel 1: 3x3 same-conv (stride=1), one (batch, H-band) tile per grid step.
#   - input band fetched by a manual double-buffered DMA (no halo concat),
#   - 9 taps = 9 MXU matmuls on row-shifted views of the flat band,
#   - fused per-channel sum / sum-of-squares partials for BatchNorm.
# -----------------------------------------------------------------------------
def _conv3x3_stats_kernel(x_hbm, w_ref, o_ref, sum_ref, ssq_ref,
                          band_buf, dma_sem, *, TH, W, Wo, n_h):
    # x_hbm   : (N, H+3, Wp, Cin_p) bf16, memory_space=ANY (stays in HBM)
    # w_ref   : (3, 3, Cin_p, Cout_p) bf16 HWIO weights (constant VMEM block)
    # o_ref   : (1, TH, Wo, Cout_p)   conv output band (bf16)
    # sum_ref : (1, 1, Cout_p) f32    per-image partial sum   (resident across h)
    # ssq_ref : (1, 1, Cout_p) f32    per-image partial sum of squares
    # band_buf: (2, TH+3, Wp, Cin_p)  double-buffered DMA landing buffer
    # dma_sem : (2,) DMA semaphores
    n = pl.program_id(0)
    h = pl.program_id(1)
    Wp, Cin_p = band_buf.shape[2], band_buf.shape[3]
    Cout_p = o_ref.shape[3]
    rows_band = (TH + 2) * Wp
    rows_out = TH * Wp

    def band_dma(h_idx, slot):
        # (TH+3) padded-H rows starting at h_idx*TH  ->  VMEM slot `slot`
        return pltpu.make_async_copy(
            x_hbm.at[n, pl.ds(h_idx * TH, TH + 3)],
            band_buf.at[slot],
            dma_sem.at[slot])

    # Prime the double-buffer and zero the statistics at the first band of every
    # image.  Everything is self-contained per image, so the batch grid axis can
    # run megacore-"parallel" on v7x.
    @pl.when(h == 0)
    def _():
        band_dma(0, 0).start()
        sum_ref[...] = jnp.zeros_like(sum_ref)
        ssq_ref[...] = jnp.zeros_like(ssq_ref)

    slot = h % 2
    band_dma(h, slot).wait()

    # Prefetch the next band of the same image while computing on this one.
    @pl.when(h + 1 < n_h)
    def _():
        band_dma(h + 1, 1 - slot).start()

    # Flatten the band onto the sublane axis (Wp % 8 == 0 -> tile-preserving).
    flat = band_buf[slot].reshape((TH + 3) * Wp, Cin_p)

    # out(y, x) needs in_padded(y+ky, x+kx): on the flattened (y*Wp + x) raster that
    # is a row offset of ky*Wp + kx.  The kx shift is applied once per kx (2 shifted
    # band copies instead of 6 misaligned tap slices); the ky offsets are then
    # 8-sublane aligned, so every tap is a clean 2-D MXU matmul.
    # TODO(synk): produce the two kx-shifted copies with pltpu.roll (XLU sublane
    # rotate) to keep the vector load/store slots completely free of the relayout.
    acc = jnp.zeros((rows_out, Cout_p), jnp.float32)
    for kx in range(3):
        shifted = flat[kx:kx + rows_band, :]                # (rows_band, Cin_p)
        for ky in range(3):
            tap = shifted[ky * Wp:ky * Wp + rows_out, :]    # aligned slice
            acc = acc + jnp.dot(tap, w_ref[ky, kx],
                                preferred_element_type=jnp.float32)
    # TODO(synk): for tiny Cin an im2col band with K = 9*Cin padded to 128 would
    # collapse the 9 matmuls (each >95% zero work when Cin << 128) into one.

    # Narrow Wp -> Wo (both multiples of 8: aligned slice, no relayout copy).
    # Conv bias is intentionally omitted: it cancels exactly under train-mode BN.
    res = acc.reshape(TH, Wp, Cout_p)[:, :Wo, :]
    o_ref[...] = res[None].astype(o_ref.dtype)

    # Fused BatchNorm batch statistics (per output channel, per-image partials).
    if Wo == W:
        res_stats = res
    else:
        col = lax.broadcasted_iota(jnp.int32, (1, Wo, 1), 1)
        res_stats = jnp.where(col < W, res, 0.0)
    sum_ref[...] += jnp.sum(res_stats, axis=(0, 1))[None, None, :]
    ssq_ref[...] += jnp.sum(res_stats * res_stats, axis=(0, 1))[None, None, :]


# -----------------------------------------------------------------------------
# Kernel 2: per-channel affine (folded BatchNorm) + optional ReLU.
# Lane-dense (rows, Cout_p) blocks over the flattened activation.
# -----------------------------------------------------------------------------
def _bn_relu_kernel(y_ref, scale_ref, shift_ref, o_ref, *, with_nonlinearity):
    y = y_ref[...].astype(jnp.float32)
    out = y * scale_ref[...] + shift_ref[...]
    if with_nonlinearity:
        out = jnp.maximum(out, 0.0)
    o_ref[...] = out.astype(o_ref.dtype)


# -----------------------------------------------------------------------------
# Wrapper = ConvBlock.forward
# -----------------------------------------------------------------------------
def conv_block_forward(x_nchw, weight_oihw, bias, gamma, beta, *,
                       with_nonlinearity=True, eps=1e-5, block_h=None,
                       compute_dtype=jnp.bfloat16, out_dtype=jnp.float32):
    del bias  # Exactly cancelled by the train-mode BatchNorm that follows the conv.

    N, Cin, H, W = x_nchw.shape
    Cout = weight_oihw.shape[0]

    Cin_p = _round_up(Cin, 128)         # lane-dense channels (MXU K dim)
    Cout_p = _round_up(Cout, 128)       # lane-dense output channels
    Wp = _round_up(W + 2, 8)            # padded width (conv halo + 8-sublane align)
    Wo = _round_up(W, 8)                # stored output width (aligned narrowing)

    vmem_cap = _vmem_capacity_bytes()
    budget = min(vmem_cap // 2, 48 << 20)      # generation-aware working-set budget

    if block_h is None:
        block_h = _pick_block_h(H, Wp, Wo, Cin_p, Cout_p, budget)
    if H % block_h != 0:
        raise ValueError(f"block_h={block_h} must divide H={H}")
    TH = block_h
    n_h = H // TH

    est = _conv_vmem_bytes(TH, Wp, Wo, Cin_p, Cout_p)
    vmem_limit = int(min(max(est + (8 << 20), 32 << 20), vmem_cap - (4 << 20)))

    # ---- layout glue (one XLA fusion): NCHW->NHWC bf16, zero-pad borders, pad C ----
    x_nhwc = jnp.transpose(x_nchw, (0, 2, 3, 1)).astype(compute_dtype)
    # H padded by (1, 2): 1 conv halo top/bottom + 1 spare row for the kx-shifted band.
    x_pad = jnp.pad(x_nhwc, ((0, 0), (1, 2), (1, Wp - W - 1), (0, Cin_p - Cin)))
    w_hwio = jnp.pad(jnp.transpose(weight_oihw, (2, 3, 1, 0)),
                     ((0, 0), (0, 0), (0, Cin_p - Cin), (0, Cout_p - Cout))
                     ).astype(compute_dtype)                 # (3, 3, Cin_p, Cout_p)

    # ---- Pallas conv (+ fused BN statistics, per-image partials) ----
    conv_kernel = functools.partial(_conv3x3_stats_kernel, TH=TH, W=W, Wo=Wo, n_h=n_h)
    conv_out, ch_sum, ch_ssq = pl.pallas_call(
        conv_kernel,
        out_shape=[
            jax.ShapeDtypeStruct((N, H, Wo, Cout_p), compute_dtype),
            jax.ShapeDtypeStruct((N, 1, Cout_p), jnp.float32),
            jax.ShapeDtypeStruct((N, 1, Cout_p), jnp.float32),
        ],
        grid=(N, n_h),
        in_specs=[
            pl.BlockSpec(memory_space=pl.ANY),               # padded input stays in HBM
            pl.BlockSpec((3, 3, Cin_p, Cout_p), lambda n, h: (0, 0, 0, 0)),
        ],
        out_specs=[
            pl.BlockSpec((1, TH, Wo, Cout_p), lambda n, h: (n, h, 0, 0)),
            pl.BlockSpec((1, 1, Cout_p), lambda n, h: (n, 0, 0)),
            pl.BlockSpec((1, 1, Cout_p), lambda n, h: (n, 0, 0)),
        ],
        scratch_shapes=[
            pltpu.VMEM((2, TH + 3, Wp, Cin_p), compute_dtype),
            pltpu.SemaphoreType.DMA((2,)),
        ],
        compiler_params=pltpu.CompilerParams(
            # Batch axis is parallel (per-image stats partials + per-image DMA chain);
            # the H-band axis accumulates stats and chains DMAs -> arbitrary.
            dimension_semantics=("parallel", "arbitrary"),
            vmem_limit_bytes=vmem_limit),
    )(x_pad, w_hwio)

    # ---- BatchNorm2d (training-mode forward: biased batch statistics) ----
    count = jnp.float32(N * H * W)
    mean = jnp.sum(ch_sum, axis=(0, 1)) / count                       # (Cout_p,)
    var = jnp.maximum(jnp.sum(ch_ssq, axis=(0, 1)) / count - mean * mean, 0.0)
    inv_std = lax.rsqrt(var + eps)
    gamma_p = jnp.pad(gamma.astype(jnp.float32), (0, Cout_p - Cout))
    beta_p = jnp.pad(beta.astype(jnp.float32), (0, Cout_p - Cout))
    scale = (gamma_p * inv_std).reshape(1, Cout_p)
    shift = (beta_p - mean * gamma_p * inv_std).reshape(1, Cout_p)
    # TODO(synk): nn.BatchNorm2d running_mean/running_var buffer updates (stateful
    # training side effect) are not modeled.

    # ---- Pallas affine + ReLU (mem-bound, lane-dense, tiling decoupled from conv) ----
    R = N * H * Wo
    TR = _pick_rows(R, Cout_p)
    y2d = conv_out.reshape(R, Cout_p)
    out2d = pl.pallas_call(
        functools.partial(_bn_relu_kernel, with_nonlinearity=with_nonlinearity),
        out_shape=jax.ShapeDtypeStruct((R, Cout_p), out_dtype),
        grid=(R // TR,),
        in_specs=[
            pl.BlockSpec((TR, Cout_p), lambda i: (i, 0)),
            pl.BlockSpec((1, Cout_p), lambda i: (0, 0)),
            pl.BlockSpec((1, Cout_p), lambda i: (0, 0)),
        ],
        out_specs=pl.BlockSpec((TR, Cout_p), lambda i: (i, 0)),
        compiler_params=pltpu.CompilerParams(
            dimension_semantics=("parallel",),
            vmem_limit_bytes=vmem_limit),
    )(y2d, scale, shift)

    # back to NCHW, drop padded width / channels (single XLA fusion).
    # TODO(synk): keep NHWC downstream (or fold the transpose into a consumer kernel)
    # to avoid this extra pass over the activation.
    out_nhwc = out2d.reshape(N, H, Wo, Cout_p)[:, :, :W, :Cout]
    return jnp.transpose(out_nhwc, (0, 3, 1, 2))


# -----------------------------------------------------------------------------
# Pure-JAX reference (same math, f32, bias included to prove its cancellation).
# -----------------------------------------------------------------------------
def _reference(x_nchw, weight_oihw, bias, gamma, beta,
               *, with_nonlinearity=True, eps=1e-5):
    y = lax.conv_general_dilated(
        x_nchw, weight_oihw, window_strides=(1, 1), padding=((1, 1), (1, 1)),
        dimension_numbers=("NCHW", "OIHW", "NCHW"))
    y = y + bias[None, :, None, None]
    mean = jnp.mean(y, axis=(0, 2, 3), keepdims=True)
    var = jnp.mean((y - mean) ** 2, axis=(0, 2, 3), keepdims=True)
    y = (y - mean) * lax.rsqrt(var + eps)
    y = y * gamma[None, :, None, None] + beta[None, :, None, None]
    if with_nonlinearity:
        y = jnp.maximum(y, 0.0)
    return y


if __name__ == "__main__":
    key = jax.random.PRNGKey(0)
    k_x, k_w, k_b, k_g, k_be = jax.random.split(key, 5)

    N, Cin, H, W = 2, 4, 16, 16
    Cout, K = 8, 3

    x = jax.random.normal(k_x, (N, Cin, H, W), jnp.float32)
    weight = 0.1 * jax.random.normal(k_w, (Cout, Cin, K, K), jnp.float32)   # OIHW
    bias = 0.05 * jax.random.normal(k_b, (Cout,), jnp.float32)
    gamma = 1.0 + 0.1 * jax.random.normal(k_g, (Cout,), jnp.float32)        # BN weight
    beta = 0.1 * jax.random.normal(k_be, (Cout,), jnp.float32)              # BN bias

    # block_h=8 -> two H-bands per image: exercises the manual double-buffered band
    # DMA, the prefetch chain and the cross-band accumulation of the BN statistics.
    out = conv_block_forward(x, weight, bias, gamma, beta,
                             with_nonlinearity=True, block_h=8)
    out = jax.block_until_ready(out)

    ref = _reference(x, weight, bias, gamma, beta, with_nonlinearity=True)
    assert out.shape == (N, Cout, H, W)
    err = jnp.max(jnp.abs(out - ref))
    assert jnp.allclose(out, ref, atol=5e-2, rtol=5e-2), f"max abs err {err}"

    print("KERNEL_OK")
</pallas_src>

<mosaic_0001>
module attributes {stable_mosaic.version = 11 : i64} {
  func.func @_conv3x3_stats_kernel(%arg0: i32, %arg1: i32, %arg2: memref<2x19x24x128xbf16, #tpu.memory_space<any>>, %arg3: memref<3x3x128x128xbf16, #tpu.memory_space<vmem>>, %arg4: memref<1x8x16x128xbf16, #tpu.memory_space<vmem>>, %arg5: memref<1x1x128xf32, #tpu.memory_space<vmem>>, %arg6: memref<1x1x128xf32, #tpu.memory_space<vmem>>, %arg7: memref<2x11x24x128xbf16, #tpu.memory_space<vmem>>, %arg8: memref<2x!tpu.dma_semaphore, #tpu.memory_space<semaphore_mem>>) attributes {dimension_semantics = [#tpu.dimension_semantics<parallel>, #tpu.dimension_semantics<arbitrary>], iteration_bounds = array<i64: 2, 2>, scalar_prefetch = 0 : i64, scratch_operands = 2 : i64, tpu.core_type = #tpu.core_type<tc>, window_params = [{}, {pipeline_mode = #tpu.pipeline_mode<synchronous>, transform_indices = @transform_1, window_bounds = array<i64: 3, 3, 128, 128>}, {transform_indices = @transform_2, window_bounds = array<i64: 1, 8, 16, 128>}, {transform_indices = @transform_3, window_bounds = array<i64: 1, 1, 128>}, {transform_indices = @transform_4, window_bounds = array<i64: 1, 1, 128>}]} {
    %c0_i32 = arith.constant 0 : i32
    %0 = arith.cmpi eq, %arg1, %c0_i32 : i32
    %1 = arith.extui %0 : i1 to i32
    %c0_i32_0 = arith.constant 0 : i32
    %2 = arith.cmpi ne, %1, %c0_i32_0 : i32
    scf.if %2 {
      %c0_i32_76 = arith.constant 0 : i32
      %c0_i32_77 = arith.constant 0 : i32
      %c0_i32_78 = arith.constant 0 : i32
      %c0_i32_79 = arith.constant 0 : i32
      %c0_i32_80 = arith.constant 0 : i32
      %93 = tpu.memref_slice %arg2[%arg0, %c0_i32_78, %c0_i32_79, %c0_i32_80] : memref<2x19x24x128xbf16, #tpu.memory_space<any>> -> memref<1x11x24x128xbf16, #tpu.memory_space<any>>
      %94 = tpu.memref_squeeze %93 : memref<1x11x24x128xbf16, #tpu.memory_space<any>> -> memref<11x24x128xbf16, #tpu.memory_space<any>>
      %c0_i32_81 = arith.constant 0 : i32
      %c0_i32_82 = arith.constant 0 : i32
      %c0_i32_83 = arith.constant 0 : i32
      %95 = tpu.memref_slice %arg7[%c0_i32_76, %c0_i32_81, %c0_i32_82, %c0_i32_83] : memref<2x11x24x128xbf16, #tpu.memory_space<vmem>> -> memref<1x11x24x128xbf16, #tpu.memory_space<vmem>>
      %96 = tpu.memref_squeeze %95 : memref<1x11x24x128xbf16, #tpu.memory_space<vmem>> -> memref<11x24x128xbf16, #tpu.memory_space<vmem>>
      %97 = tpu.memref_slice %arg8[%c0_i32_77] : memref<2x!tpu.dma_semaphore, #tpu.memory_space<semaphore_mem>> -> memref<1x!tpu.dma_semaphore, #tpu.memory_space<semaphore_mem>>
      %98 = tpu.memref_squeeze %97 : memref<1x!tpu.dma_semaphore, #tpu.memory_space<semaphore_mem>> -> memref<!tpu.dma_semaphore, #tpu.memory_space<semaphore_mem>>
      tpu.enqueue_dma source(%94 : memref<11x24x128xbf16, #tpu.memory_space<any>>) target(%96 : memref<11x24x128xbf16, #tpu.memory_space<vmem>>) target_semaphore(%98 : memref<!tpu.dma_semaphore, #tpu.memory_space<semaphore_mem>>)
      %cst_84 = arith.constant 0.000000e+00 : f32
      %99 = vector.broadcast %cst_84 : f32 to vector<1x1x128xf32>
      %c0_85 = arith.constant 0 : index
      %c0_86 = arith.constant 0 : index
      %c0_87 = arith.constant 0 : index
      %100 = vector.load %arg5[%c0_85, %c0_86, %c0_87] : memref<1x1x128xf32, #tpu.memory_space<vmem>>, vector<1x1x128xf32>
      tpu.vector_store %arg5[%c0_85, %c0_86, %c0_87], %99 {strides = array<i32>} : memref<1x1x128xf32, #tpu.memory_space<vmem>>, vector<1x1x128xf32>,
      %cst_88 = arith.constant 0.000000e+00 : f32
      %101 = vector.broadcast %cst_88 : f32 to vector<1x1x128xf32>
      %c0_89 = arith.constant 0 : index
      %c0_90 = arith.constant 0 : index
      %c0_91 = arith.constant 0 : index
      %102 = vector.load %arg6[%c0_89, %c0_90, %c0_91] : memref<1x1x128xf32, #tpu.memory_space<vmem>>, vector<1x1x128xf32>
      tpu.vector_store %arg6[%c0_89, %c0_90, %c0_91], %101 {strides = array<i32>} : memref<1x1x128xf32, #tpu.memory_space<vmem>>, vector<1x1x128xf32>,
    } else {
    }
    %c2_i32 = arith.constant 2 : i32
    %c0_i32_1 = arith.constant 0 : i32
    %3 = arith.cmpi eq, %c2_i32, %c0_i32_1 : i32
    %c1_i32 = arith.constant 1 : i32
    %4 = arith.select %3, %c1_i32, %c2_i32 : i32
    %5 = arith.remsi %arg1, %4 : i32
    %c0_i32_2 = arith.constant 0 : i32
    %6 = arith.cmpi ne, %5, %c0_i32_2 : i32
    %c0_i32_3 = arith.constant 0 : i32
    %7 = arith.cmpi slt, %5, %c0_i32_3 : i32
    %c0_i32_4 = arith.constant 0 : i32
    %8 = arith.cmpi slt, %4, %c0_i32_4 : i32
    %9 = arith.xori %7, %8 : i1
    %10 = arith.andi %9, %6 : i1
    %11 = arith.addi %5, %4 : i32
    %12 = arith.select %10, %11, %5 : i32
    %c8_i32 = arith.constant 8 : i32
    %13 = arith.muli %arg1, %c8_i32 : i32
    %c0_i32_5 = arith.constant 0 : i32
    %c0_i32_6 = arith.constant 0 : i32
    %14 = tpu.memref_slice %arg2[%arg0, %13, %c0_i32_5, %c0_i32_6] : memref<2x19x24x128xbf16, #tpu.memory_space<any>> -> memref<1x11x24x128xbf16, #tpu.memory_space<any>>
    %15 = tpu.memref_squeeze %14 : memref<1x11x24x128xbf16, #tpu.memory_space<any>> -> memref<11x24x128xbf16, #tpu.memory_space<any>>
    %c0_i32_7 = arith.constant 0 : i32
    %c0_i32_8 = arith.constant 0 : i32
    %c0_i32_9 = arith.constant 0 : i32
    %16 = tpu.memref_slice %arg7[%12, %c0_i32_7, %c0_i32_8, %c0_i32_9] : memref<2x11x24x128xbf16, #tpu.memory_space<vmem>> -> memref<1x11x24x128xbf16, #tpu.memory_space<vmem>>
    %17 = tpu.memref_squeeze %16 : memref<1x11x24x128xbf16, #tpu.memory_space<vmem>> -> memref<11x24x128xbf16, #tpu.memory_space<vmem>>
    %18 = tpu.memref_slice %arg8[%12] : memref<2x!tpu.dma_semaphore, #tpu.memory_space<semaphore_mem>> -> memref<1x!tpu.dma_semaphore, #tpu.memory_space<semaphore_mem>>
    %19 = tpu.memref_squeeze %18 : memref<1x!tpu.dma_semaphore, #tpu.memory_space<semaphore_mem>> -> memref<!tpu.dma_semaphore, #tpu.memory_space<semaphore_mem>>
    tpu.wait_dma2 semaphore(%19 : memref<!tpu.dma_semaphore, #tpu.memory_space<semaphore_mem>>) src(%15 : memref<11x24x128xbf16, #tpu.memory_space<any>>) dst(%17 : memref<11x24x128xbf16, #tpu.memory_space<vmem>>)
    %c1_i32_10 = arith.constant 1 : i32
    %20 = arith.addi %arg1, %c1_i32_10 : i32
    %c2_i32_11 = arith.constant 2 : i32
    %21 = arith.cmpi slt, %20, %c2_i32_11 : i32
    %22 = arith.extui %21 : i1 to i32
    %c0_i32_12 = arith.constant 0 : i32
    %23 = arith.cmpi ne, %22, %c0_i32_12 : i32
    scf.if %23 {
      %c1_i32_76 = arith.constant 1 : i32
      %93 = arith.addi %arg1, %c1_i32_76 : i32
      %c1_i32_77 = arith.constant 1 : i32
      %94 = arith.subi %c1_i32_77, %12 : i32
      %c8_i32_78 = arith.constant 8 : i32
      %95 = arith.muli %93, %c8_i32_78 : i32
      %c0_i32_79 = arith.constant 0 : i32
      %c0_i32_80 = arith.constant 0 : i32
      %96 = tpu.memref_slice %arg2[%arg0, %95, %c0_i32_79, %c0_i32_80] : memref<2x19x24x128xbf16, #tpu.memory_space<any>> -> memref<1x11x24x128xbf16, #tpu.memory_space<any>>
      %97 = tpu.memref_squeeze %96 : memref<1x11x24x128xbf16, #tpu.memory_space<any>> -> memref<11x24x128xbf16, #tpu.memory_space<any>>
      %c0_i32_81 = arith.constant 0 : i32
      %c0_i32_82 = arith.constant 0 : i32
      %c0_i32_83 = arith.constant 0 : i32
      %98 = tpu.memref_slice %arg7[%94, %c0_i32_81, %c0_i32_82, %c0_i32_83] : memref<2x11x24x128xbf16, #tpu.memory_space<vmem>> -> memref<1x11x24x128xbf16, #tpu.memory_space<vmem>>
      %99 = tpu.memref_squeeze %98 : memref<1x11x24x128xbf16, #tpu.memory_space<vmem>> -> memref<11x24x128xbf16, #tpu.memory_space<vmem>>
      %100 = tpu.memref_slice %arg8[%94] : memref<2x!tpu.dma_semaphore, #tpu.memory_space<semaphore_mem>> -> memref<1x!tpu.dma_semaphore, #tpu.memory_space<semaphore_mem>>
      %101 = tpu.memref_squeeze %100 : memref<1x!tpu.dma_semaphore, #tpu.memory_space<semaphore_mem>> -> memref<!tpu.dma_semaphore, #tpu.memory_space<semaphore_mem>>
      tpu.enqueue_dma source(%97 : memref<11x24x128xbf16, #tpu.memory_space<any>>) target(%99 : memref<11x24x128xbf16, #tpu.memory_space<vmem>>) target_semaphore(%101 : memref<!tpu.dma_semaphore, #tpu.memory_space<semaphore_mem>>)
    } else {
    }
    %24 = arith.index_cast %12 : i32 to index
    %c0 = arith.constant 0 : index
    %c0_13 = arith.constant 0 : index
    %c0_14 = arith.constant 0 : index
    %25 = vector.load %arg7[%24, %c0, %c0_13, %c0_14] : memref<2x11x24x128xbf16, #tpu.memory_space<vmem>>, vector<1x11x24x128xbf16>
    %26 = vector.shape_cast %25 : vector<1x11x24x128xbf16> to vector<11x24x128xbf16>
    %27 = vector.shape_cast %26 : vector<11x24x128xbf16> to vector<264x128xbf16>
    %cst = arith.constant 0.000000e+00 : f32
    %28 = vector.broadcast %cst : f32 to vector<192x128xf32>
    %29 = vector.extract_strided_slice %27 {offsets = [0, 0], sizes = [240, 128], strides = [1, 1]} : vector<264x128xbf16> to vector<240x128xbf16>
    %30 = vector.extract_strided_slice %29 {offsets = [0, 0], sizes = [192, 128], strides = [1, 1]} : vector<240x128xbf16> to vector<192x128xbf16>
    %c0_15 = arith.constant 0 : index
    %c0_16 = arith.constant 0 : index
    %c0_17 = arith.constant 0 : index
    %c0_18 = arith.constant 0 : index
    %31 = vector.load %arg3[%c0_15, %c0_16, %c0_17, %c0_18] : memref<3x3x128x128xbf16, #tpu.memory_space<vmem>>, vector<1x1x128x128xbf16>
    %32 = vector.shape_cast %31 : vector<1x1x128x128xbf16> to vector<128x128xbf16>
    %cst_19 = arith.constant dense<0.000000e+00> : vector<192x128xf32>
    %33 = tpu.matmul %30, %32, %cst_19 {dimension_numbers = #tpu.dot_dimension_numbers<[1], [0], [0], [1], [0, 0, 1, 1], [], []>} : vector<192x128xbf16>, vector<128x128xbf16>, vector<192x128xf32> -> vector<192x128xf32>
    %34 = arith.addf %28, %33 : vector<192x128xf32>
    %35 = vector.extract_strided_slice %29 {offsets = [24, 0], sizes = [192, 128], strides = [1, 1]} : vector<240x128xbf16> to vector<192x128xbf16>
    %c1 = arith.constant 1 : index
    %c0_20 = arith.constant 0 : index
    %c0_21 = arith.constant 0 : index
    %c0_22 = arith.constant 0 : index
    %36 = vector.load %arg3[%c1, %c0_20, %c0_21, %c0_22] : memref<3x3x128x128xbf16, #tpu.memory_space<vmem>>, vector<1x1x128x128xbf16>
    %37 = vector.shape_cast %36 : vector<1x1x128x128xbf16> to vector<128x128xbf16>
    %cst_23 = arith.constant dense<0.000000e+00> : vector<192x128xf32>
    %38 = tpu.matmul %35, %37, %cst_23 {dimension_numbers = #tpu.dot_dimension_numbers<[1], [0], [0], [1], [0, 0, 1, 1], [], []>} : vector<192x128xbf16>, vector<128x128xbf16>, vector<192x128xf32> -> vector<192x128xf32>
    %39 = arith.addf %34, %38 : vector<192x128xf32>
    %40 = vector.extract_strided_slice %29 {offsets = [48, 0], sizes = [192, 128], strides = [1, 1]} : vector<240x128xbf16> to vector<192x128xbf16>
    %c2 = arith.constant 2 : index
    %c0_24 = arith.constant 0 : index
    %c0_25 = arith.constant 0 : index
    %c0_26 = arith.constant 0 : index
    %41 = vector.load %arg3[%c2, %c0_24, %c0_25, %c0_26] : memref<3x3x128x128xbf16, #tpu.memory_space<vmem>>, vector<1x1x128x128xbf16>
    %42 = vector.shape_cast %41 : vector<1x1x128x128xbf16> to vector<128x128xbf16>
    %cst_27 = arith.constant dense<0.000000e+00> : vector<192x128xf32>
    %43 = tpu.matmul %40, %42, %cst_27 {dimension_numbers = #tpu.dot_dimension_numbers<[1], [0], [0], [1], [0, 0, 1, 1], [], []>} : vector<192x128xbf16>, vector<128x128xbf16>, vector<192x128xf32> -> vector<192x128xf32>
    %44 = arith.addf %39, %43 : vector<192x128xf32>
    %45 = vector.extract_strided_slice %27 {offsets = [1, 0], sizes = [240, 128], strides = [1, 1]} : vector<264x128xbf16> to vector<240x128xbf16>
    %46 = vector.extract_strided_slice %45 {offsets = [0, 0], sizes = [192, 128], strides = [1, 1]} : vector<240x128xbf16> to vector<192x128xbf16>
    %c0_28 = arith.constant 0 : index
    %c1_29 = arith.constant 1 : index
    %c0_30 = arith.constant 0 : index
    %c0_31 = arith.constant 0 : index
    %47 = vector.load %arg3[%c0_28, %c1_29, %c0_30, %c0_31] : memref<3x3x128x128xbf16, #tpu.memory_space<vmem>>, vector<1x1x128x128xbf16>
    %48 = vector.shape_cast %47 : vector<1x1x128x128xbf16> to vector<128x128xbf16>
    %cst_32 = arith.constant dense<0.000000e+00> : vector<192x128xf32>
    %49 = tpu.matmul %46, %48, %cst_32 {dimension_numbers = #tpu.dot_dimension_numbers<[1], [0], [0], [1], [0, 0, 1, 1], [], []>} : vector<192x128xbf16>, vector<128x128xbf16>, vector<192x128xf32> -> vector<192x128xf32>
    %50 = arith.addf %44, %49 : vector<192x128xf32>
    %51 = vector.extract_strided_slice %45 {offsets = [24, 0], sizes = [192, 128], strides = [1, 1]} : vector<240x128xbf16> to vector<192x128xbf16>
    %c1_33 = arith.constant 1 : index
    %c1_34 = arith.constant 1 : index
    %c0_35 = arith.constant 0 : index
    %c0_36 = arith.constant 0 : index
    %52 = vector.load %arg3[%c1_33, %c1_34, %c0_35, %c0_36] : memref<3x3x128x128xbf16, #tpu.memory_space<vmem>>, vector<1x1x128x128xbf16>
    %53 = vector.shape_cast %52 : vector<1x1x128x128xbf16> to vector<128x128xbf16>
    %cst_37 = arith.constant dense<0.000000e+00> : vector<192x128xf32>
    %54 = tpu.matmul %51, %53, %cst_37 {dimension_numbers = #tpu.dot_dimension_numbers<[1], [0], [0], [1], [0, 0, 1, 1], [], []>} : vector<192x128xbf16>, vector<128x128xbf16>, vector<192x128xf32> -> vector<192x128xf32>
    %55 = arith.addf %50, %54 : vector<192x128xf32>
    %56 = vector.extract_strided_slice %45 {offsets = [48, 0], sizes = [192, 128], strides = [1, 1]} : vector<240x128xbf16> to vector<192x128xbf16>
    %c2_38 = arith.constant 2 : index
    %c1_39 = arith.constant 1 : index
    %c0_40 = arith.constant 0 : index
    %c0_41 = arith.constant 0 : index
    %57 = vector.load %arg3[%c2_38, %c1_39, %c0_40, %c0_41] : memref<3x3x128x128xbf16, #tpu.memory_space<vmem>>, vector<1x1x128x128xbf16>
    %58 = vector.shape_cast %57 : vector<1x1x128x128xbf16> to vector<128x128xbf16>
    %cst_42 = arith.constant dense<0.000000e+00> : vector<192x128xf32>
    %59 = tpu.matmul %56, %58, %cst_42 {dimension_numbers = #tpu.dot_dimension_numbers<[1], [0], [0], [1], [0, 0, 1, 1], [], []>} : vector<192x128xbf16>, vector<128x128xbf16>, vector<192x128xf32> -> vector<192x128xf32>
    %60 = arith.addf %55, %59 : vector<192x128xf32>
    %61 = vector.extract_strided_slice %27 {offsets = [2, 0], sizes = [240, 128], strides = [1, 1]} : vector<264x128xbf16> to vector<240x128xbf16>
    %62 = vector.extract_strided_slice %61 {offsets = [0, 0], sizes = [192, 128], strides = [1, 1]} : vector<240x128xbf16> to vector<192x128xbf16>
    %c0_43 = arith.constant 0 : index
    %c2_44 = arith.constant 2 : index
    %c0_45 = arith.constant 0 : index
    %c0_46 = arith.constant 0 : index
    %63 = vector.load %arg3[%c0_43, %c2_44, %c0_45, %c0_46] : memref<3x3x128x128xbf16, #tpu.memory_space<vmem>>, vector<1x1x128x128xbf16>
    %64 = vector.shape_cast %63 : vector<1x1x128x128xbf16> to vector<128x128xbf16>
    %cst_47 = arith.constant dense<0.000000e+00> : vector<192x128xf32>
    %65 = tpu.matmul %62, %64, %cst_47 {dimension_numbers = #tpu.dot_dimension_numbers<[1], [0], [0], [1], [0, 0, 1, 1], [], []>} : vector<192x128xbf16>, vector<128x128xbf16>, vector<192x128xf32> -> vector<192x128xf32>
    %66 = arith.addf %60, %65 : vector<192x128xf32>
    %67 = vector.extract_strided_slice %61 {offsets = [24, 0], sizes = [192, 128], strides = [1, 1]} : vector<240x128xbf16> to vector<192x128xbf16>
    %c1_48 = arith.constant 1 : index
    %c2_49 = arith.constant 2 : index
    %c0_50 = arith.constant 0 : index
    %c0_51 = arith.constant 0 : index
    %68 = vector.load %arg3[%c1_48, %c2_49, %c0_50, %c0_51] : memref<3x3x128x128xbf16, #tpu.memory_space<vmem>>, vector<1x1x128x128xbf16>
    %69 = vector.shape_cast %68 : vector<1x1x128x128xbf16> to vector<128x128xbf16>
    %cst_52 = arith.constant dense<0.000000e+00> : vector<192x128xf32>
    %70 = tpu.matmul %67, %69, %cst_52 {dimension_numbers = #tpu.dot_dimension_numbers<[1], [0], [0], [1], [0, 0, 1, 1], [], []>} : vector<192x128xbf16>, vector<128x128xbf16>, vector<192x128xf32> -> vector<192x128xf32>
    %71 = arith.addf %66, %70 : vector<192x128xf32>
    %72 = vector.extract_strided_slice %61 {offsets = [48, 0], sizes = [192, 128], strides = [1, 1]} : vector<240x128xbf16> to vector<192x128xbf16>
    %c2_53 = arith.constant 2 : index
    %c2_54 = arith.constant 2 : index
    %c0_55 = arith.constant 0 : index
    %c0_56 = arith.constant 0 : index
    %73 = vector.load %arg3[%c2_53, %c2_54, %c0_55, %c0_56] : memref<3x3x128x128xbf16, #tpu.memory_space<vmem>>, vector<1x1x128x128xbf16>
    %74 = vector.shape_cast %73 : vector<1x1x128x128xbf16> to vector<128x128xbf16>
    %cst_57 = arith.constant dense<0.000000e+00> : vector<192x128xf32>
    %75 = tpu.matmul %72, %74, %cst_57 {dimension_numbers = #tpu.dot_dimension_numbers<[1], [0], [0], [1], [0, 0, 1, 1], [], []>} : vector<192x128xbf16>, vector<128x128xbf16>, vector<192x128xf32> -> vector<192x128xf32>
    %76 = arith.addf %71, %75 : vector<192x128xf32>
    %77 = vector.shape_cast %76 : vector<192x128xf32> to vector<8x24x128xf32>
    %78 = vector.extract_strided_slice %77 {offsets = [0, 0, 0], sizes = [8, 16, 128], strides = [1, 1, 1]} : vector<8x24x128xf32> to vector<8x16x128xf32>
    %79 = vector.shape_cast %78 : vector<8x16x128xf32> to vector<1x8x16x128xf32>
    %80 = arith.truncf %79 : vector<1x8x16x128xf32> to vector<1x8x16x128xbf16>
    %c0_58 = arith.constant 0 : index
    %c0_59 = arith.constant 0 : index
    %c0_60 = arith.constant 0 : index
    %c0_61 = arith.constant 0 : index
    %81 = vector.load %arg4[%c0_58, %c0_59, %c0_60, %c0_61] : memref<1x8x16x128xbf16, #tpu.memory_space<vmem>>, vector<1x8x16x128xbf16>
    tpu.vector_store %arg4[%c0_58, %c0_59, %c0_60, %c0_61], %80 {strides = array<i32>} : memref<1x8x16x128xbf16, #tpu.memory_space<vmem>>, vector<1x8x16x128xbf16>,
    %c0_62 = arith.constant 0 : index
    %c0_63 = arith.constant 0 : index
    %c0_64 = arith.constant 0 : index
    %82 = vector.load %arg5[%c0_62, %c0_63, %c0_64] : memref<1x1x128xf32, #tpu.memory_space<vmem>>, vector<1x1x128xf32>
    %cst_65 = arith.constant dense<0.000000e+00> : vector<128xf32>
    %83 = vector.multi_reduction <add>, %78, %cst_65 [0, 1] : vector<8x16x128xf32> to vector<128xf32>
    %84 = vector.shape_cast %83 : vector<128xf32> to vector<1x1x128xf32>
    %85 = arith.addf %82, %84 : vector<1x1x128xf32>
    %c0_66 = arith.constant 0 : index
    %c0_67 = arith.constant 0 : index
    %c0_68 = arith.constant 0 : index
    %86 = vector.load %arg5[%c0_66, %c0_67, %c0_68] : memref<1x1x128xf32, #tpu.memory_space<vmem>>, vector<1x1x128xf32>
    tpu.vector_store %arg5[%c0_66, %c0_67, %c0_68], %85 {strides = array<i32>} : memref<1x1x128xf32, #tpu.memory_space<vmem>>, vector<1x1x128xf32>,
    %c0_69 = arith.constant 0 : index
    %c0_70 = arith.constant 0 : index
    %c0_71 = arith.constant 0 : index
    %87 = vector.load %arg6[%c0_69, %c0_70, %c0_71] : memref<1x1x128xf32, #tpu.memory_space<vmem>>, vector<1x1x128xf32>
    %88 = arith.mulf %78, %78 : vector<8x16x128xf32>
    %cst_72 = arith.constant dense<0.000000e+00> : vector<128xf32>
    %89 = vector.multi_reduction <add>, %88, %cst_72 [0, 1] : vector<8x16x128xf32> to vector<128xf32>
    %90 = vector.shape_cast %89 : vector<128xf32> to vector<1x1x128xf32>
    %91 = arith.addf %87, %90 : vector<1x1x128xf32>
    %c0_73 = arith.constant 0 : index
    %c0_74 = arith.constant 0 : index
    %c0_75 = arith.constant 0 : index
    %92 = vector.load %arg6[%c0_73, %c0_74, %c0_75] : memref<1x1x128xf32, #tpu.memory_space<vmem>>, vector<1x1x128xf32>
    tpu.vector_store %arg6[%c0_73, %c0_74, %c0_75], %91 {strides = array<i32>} : memref<1x1x128xf32, #tpu.memory_space<vmem>>, vector<1x1x128xf32>,
    return
  }
  func.func @transform_1(%arg0: i32, %arg1: i32) -> (i32, i32, i32, i32) {
    %c0_i32 = arith.constant 0 : i32
    %c0_i32_0 = arith.constant 0 : i32
    %c0_i32_1 = arith.constant 0 : i32
    %c0_i32_2 = arith.constant 0 : i32
    %c0_i32_3 = arith.constant 0 : i32
    return %c0_i32, %c0_i32_0, %c0_i32_1, %c0_i32_2 : i32, i32, i32, i32
  }
  func.func @transform_2(%arg0: i32, %arg1: i32) -> (i32, i32, i32, i32) {
    %c0_i32 = arith.constant 0 : i32
    %c0_i32_0 = arith.constant 0 : i32
    %c0_i32_1 = arith.constant 0 : i32
    return %arg0, %arg1, %c0_i32, %c0_i32_0 : i32, i32, i32, i32
  }
  func.func @transform_3(%arg0: i32, %arg1: i32) -> (i32, i32, i32) {
    %c0_i32 = arith.constant 0 : i32
    %c0_i32_0 = arith.constant 0 : i32
    %c0_i32_1 = arith.constant 0 : i32
    return %arg0, %c0_i32, %c0_i32_0 : i32, i32, i32
  }
  func.func @transform_4(%arg0: i32, %arg1: i32) -> (i32, i32, i32) {
    %c0_i32 = arith.constant 0 : i32
    %c0_i32_0 = arith.constant 0 : i32
    %c0_i32_1 = arith.constant 0 : i32
    return %arg0, %c0_i32, %c0_i32_0 : i32, i32, i32
  }
}

</mosaic_0001>

<bundles_post_ra>
// kernel: tpu_custom_call.1
= control target key start
LH: loop header
LB: loop body
LE: loop exit
PB: predicated region body
PF: predicated region fallthrough
CT: control target
= control target key end

     0   :  { %s5334_s0 = inlined_call_operand.hbm [shape: bf16[2,19,24,128], index: 0, kind: input, shape index: {}]   ;;  %s5335_s1 = inlined_call_operand.hbm [shape: bf16[3,3,128,128], index: 1, kind: input, shape index: {}]   ;;  %s5336_s2 = inlined_call_operand.hbm [shape: bf16[2,16,16,128], index: 2, kind: output, shape index: {0}]   ;;  %s5337_s3 = inlined_call_operand.hbm [shape: f32[2,1,128], index: 3, kind: output, shape index: {1}]   ;;  %s5338_s4 = inlined_call_operand.hbm [shape: f32[2,1,128], index: 4, kind: output, shape index: {2}]  }
   0x1   :  { %5354 = sst [smem:[#allocation32_spill]] %s5335_s1 }
   0x2   :  { %10 = vsyncpa [#allocation5], 0 }
   0x3   :  { %11 = vsyncpa [#allocation6], 0 }
   0x4   :  { %13 = vsyncpa [#allocation6 + $0x1], 0 }
   0x5   :  { %14 = vsyncpa [#allocation9], 0 }
   0x6   :  { %16 = vsyncpa [#allocation9 + $0x1], 0  ;;  %s4374_s15 = smov 0   ;;  %s4376_s16 = smov 0  }
   0x7   :  { %s4378_s17 = smov 0   ;;  %s4380_s18 = smov 0  }
   0x8   :  { %s4382_s19 = smov 0   ;;  %s4384_s20 = smov 0  }
   0x9   :  { %s4386_s21 = smov 0   ;;  %s4388_s22 = smov 0  }
   0xa   :  { %s4390_s23 = smov 0   ;;  %s4392_s24 = smov 0  }
   0xb   :  { %s4394_s25 = smov 0  }
   0xc LB: > { %5355 = sst [smem:[#allocation21_spill]] %s4300_s16  ;;  %s4430_s26 = sadd.s32 4294967295, %s4336_s25   ;;  %s4336_s25 = sphi %s4394_s25, %s22_s25   ;;  %s4332_s24 = sphi %s4392_s24, %s5394_s24   ;;  %s4328_s23 = sphi %s4390_s23, %s5397_s23   ;;  %s4324_s22 = sphi %s4388_s22, %s5392_s22   ;;  %s4320_s21 = sphi %s4386_s21, %s5391_s21   ;;  %s4316_s20 = sphi %s4384_s20, %s5390_s20   ;;  %s4312_s19 = sphi %s4382_s19, %s5396_s19   ;;  %s4308_s18 = sphi %s4380_s18, %s5395_s18   ;;  %s4304_s17 = sphi %s4378_s17, %s5388_s17   ;;  %s4300_s16 = sphi %s4376_s16, %s5387_s16   ;;  %s4296_s15 = sphi %s4374_s15, %s5386_s15  }
   0xd   : > { %5356 = sst [smem:[#allocation22_spill]] %s4304_s17  ;;  %s5339_s27 = sadd.s32 4294967294, %s4336_s25  }
   0xe   : > { %5357 = sst [smem:[#allocation23_spill]] %s4316_s20  ;;  %s31_s28 = sadd.s32 1, %s4328_s23 }
   0xf   : > { %5358 = sst [smem:[#allocation24_spill]] %s4328_s23  ;;  %s34_s29 = sadd.s32 1, %s4332_s24 }
  0x10   : > { %5359 = sst [smem:[#allocation25_spill]] %s4332_s24  ;;  %p32_p0 = scmp.ge.s32.totalorder %s31_s28, 2 }
  0x11   : > { %s64_s30 = sadd.s32 1, %s4316_s20  ;;  %p74_p1 = scmp.ne.s32.totalorder %s4316_s20, %s4312_s19 }
  0x12   : > { %p75_p2 = scmp.eq.s32.totalorder %s4430_s26, 3  ;;  %s5399_s28 = smov (%p32_p0, %s31_s28), 0 }
  0x13   : > { %5360 = sst [smem:[#allocation26_spill]] %s5399_s28  ;;  %s5401_s29 = smov (!%p32_p0, %s34_s29), %s4332_s24 }
  0x14   : > { %s60_s5 = ssub.s32 %s4328_s23, %s5399_s28  ;;  %p4446_p3 = por %p75_p2, %p74_p1 }
  0x15   : > { %p36_p4 = scmp.ge.s32.totalorder %s5401_s29, 2  ;;  %p80_p5 = scmp.ne.s32.totalorder %s4312_s19, %s4308_s18 }
  0x16   : > { %s5361_s6 = scalar_select %p4446_p3, 1, 0 }
  0x17   : > { %p4454_p6 = scmp.eq.s32.totalorder %s5339_s27, 3  ;;  %s90_s8 = sadd.s32 1, %s4304_s17 }
  0x18   : > { %s5403_s29 = smov (%p36_p4, %s5401_s29), 0  ;;  %p100_p8 = scmp.ne.s32.totalorder %s4304_s17, %s4300_s16 }
  0x19   : > { %5363 = sst [smem:[#allocation27_spill]] %s5403_s29  ;;  %p4463_p7 = por %p4454_p6, %p80_p5 }
  0x1a   : > { %s59_s10 = ssub.s32 %s4332_s24, %s5403_s29  ;;  %p106_p9 = scmp.ne.s32.totalorder %s4300_s16, %s4296_s15 }
  0x1b   : > { %s5364_s9 = scalar_select %p4463_p7, 1, 0 }
  0x1c   : > { %s61_s11 = sor.u32 %s60_s5, %s59_s10  ;;  %p88_p10 = scmp.eq.s32.totalorder %s59_s10, 0 }
  0x1d   : > { %5365 = sst [smem:[#allocation28_spill]] %s5364_s9  ;;  %p62_p11 = scmp.eq.s32.totalorder %s61_s11, 0 }
  0x1e   : > { %p4475_p12 = por %p100_p8, %p75_p2  ;;  %p4487_p13 = por %p106_p9, %p4454_p6 }
  0x1f   : > { %s4480_s13 = scalar_select %p88_p10, %s4304_s17, %s90_s8  }
  0x20   : > { %s5366_s12 = scalar_select %p4475_p12, 1, 0 }
  0x21   : > { %5367 = sst [smem:[#allocation29_spill]] %s4480_s13  ;;  %p2898_p0 = scmp.ge.s32.totalorder %s4336_s25, 1 }
  0x22   : > { %s4483_s14 = scalar_select %p62_p11, %s4316_s20, %s64_s30  }
  0x23   : > { %s5369_s27 = scalar_select %p4487_p13, 1, 0 }
  0x24   : > { %5368 = sst [smem:[#allocation30_spill]] %s4483_s14  ;;  %p140_p1 = scmp.lt.s32.totalorder %s4336_s25, 5 }
  0x25   : > { %5370 = sst [smem:[#allocation31_spill]] %s5369_s27  ;;  %p5344_p4 = scmp.eq.s32.totalorder %s4430_s26, 0 }
  0x26   : > { %p4494_p5 = pnand %p2898_p0, %p140_p1  ;;  %s4338_s5 = smov [#allocation4]  }
  0x27   : > { %s152_s10 = sshll.u32 %s4338_s5, 4  ;;  %s5373_s1 = sld [smem:[#allocation32_spill]]  ;;  %s153_s10 = int_to_ptr.vmem [resolvable:$true] %s152_s10 }
  0x28   : > { %s5371_s15 = scalar_select %p4494_p5, 1, 0 }
  0x29   : > { %p3856_p2 = pneg %p4494_p5 }
  0x2b   : > { %p4502_p8 = pnand %p5344_p4, %p3856_p2 }
  0x2d   : > { %s4071_s11 = scalar_lea.hbm %s5373_s1, 9216  ;;  %p4073_p9 = pneg %p4502_p8 }
  0x2e   : > { %p4072_p6 = scmp.ne.s32.totalorder %s5373_s1, %s4071_s11  ;;  %p4078_p0 = scmp.lt.u32.totalorder %s4071_s11, %s5373_s1 }
  0x30   : > { %p4074_p10 = pnand %p4073_p9, %p4072_p6 }
  0x32   : > { %p4075_p11 = pneg %p4074_p10 }
  0x34   : > { %p4080_p1 = pnand %p4078_p0, %p4075_p11 }
  0x36   : > { %4083 = shalt.err (!%p4080_p1)
}
  0x37   : > { %s4084_s23 = scalar_lea.vmem %s153_s10, 9216  ;;  %p4092_p7 = scmp.lt.s32.totalorder %s153_s10, %s153_s10 }
  0x38   : > { %p4085_p2 = scmp.ne.s32.totalorder %s153_s10, %s4084_s23  ;;  %p4093_p12 = scmp.lt.s32.totalorder %s4084_s23, %s4084_s23 }
  0x3a   : > { %p4087_p4 = pnand %p4085_p2, %p4073_p9  ;;  %p4094_p3 = por %p4093_p12, %p4092_p7 }
  0x3c   : > { %p4088_p13 = pneg %p4087_p4 }
  0x3e   : > { %p4095_p5 = pnand %p4094_p3, %p4088_p13 }
  0x40   : > { %4098 = shalt.err (!%p4095_p5)
}
  0x41   : > { %s4339_s28 = smov 64   ;;  %s4340_s29 = smov 4  }
  0x42   : > { %3859 = dma.hbm_to_vmem [thread:$0]  (!%p4502_p8), %s5373_s1, 9216, %s153_s10, [#allocation5], %s4339_s28, %s4339_s28, %s4340_s29  }
  0x43   : > { %p5374_p6 = scmp.ne.s32.totalorder %s5371_s15, 0 }
  0x44   : > { %p5375_p10 = scmp.eq.s32.totalorder (!%p5374_p6), %s4430_s26, 0 }
  0x45   : > { %168 = sbr.rel (%p5374_p6) target bundleno = 682 (0x2aa), region = 24 }
  0x4c   : > { %4281 = dma.done.wait (%p5375_p10), [#allocation5], 9216   ;;  %p5376_p4 = pmov %p5375_p10 }
  0x4d   : > { %s5348_s23 = sand.u32 1, %s4312_s19   ;;  %s187_s24 = sand.u32 1, %s4300_s16  }
  0x4e   : > { %4283 = vsyncadd (%p5376_p4), [#allocation5], 4294958080  ;;  %s2902_s30 = sshll.u32 %s5348_s23, 6  ;;  %s4534_s5 = scalar_lea.vmem [#allocation8], %s187_s24 }
  0x4f   : > { %s4532_s11 = scalar_lea.vmem [#allocation7], %s2902_s30  ;;  %s4536_s10 = scalar_lea.vmem [#allocation10], %s187_s24 }
  0x50   : > { %p2903_p3 = scmp.ne.s32.totalorder %s4320_s21, 0 }
  0x51   : > { %s3041_s15 = smul.u32 (!%p2903_p3), 3648, %s4324_s22  ;;  %s4341_s28 = smov (!%p2903_p3), [#allocation2]   ;;  %v4342_v0 = vmov (!%p2903_p3), 0.0  }
  0x52   : > { %200 = sbr.rel (%p2903_p3) target bundleno = 104 (0x68), region = 32  ;;  %s211_s29 = sshll.u32 (!%p2903_p3), %s4341_s28, 4  ;;  %215 = vst [vmem:[%s4534_s5] sm:$0x1] (!%p2903_p3), %v4342_v0  ;;  %216 = vst [vmem:[%s4536_s10] sm:$0x1] (!%p2903_p3), %v4342_v0  ;;  %s212_s29 = int_to_ptr.vmem [resolvable:$true] %s211_s29 }
  0x53   : > { %s203_s30 = scalar_lea.hbm (!%p2903_p3), %s5334_s0, %s3041_s15  ;;  %s4101_s14 = scalar_lea.hbm (!%p2903_p3), %s5334_s0, 7296 }
  0x54   : > { %s4099_s23 = scalar_lea.hbm (!%p2903_p3), %s203_s30, 2112  ;;  %p4102_p12 = scmp.lt.u32.totalorder (!%p2903_p3), %s203_s30, %s5334_s0 }
  0x55   : > { %p4100_p7 = scmp.ne.s32.totalorder (!%p2903_p3), %s203_s30, %s4099_s23  ;;  %p4103_p13 = scmp.lt.u32.totalorder (!%p2903_p3), %s4101_s14, %s4099_s23 }
  0x56   : > { %p4105_p8 = scmp.lt.u32.totalorder (!%p2903_p3), %s4099_s23, %s203_s30 }
  0x57   : > { %p4104_p5 = por (!%p2903_p3), %p4103_p13, %p4102_p12 }
  0x59   : > { %p4106_p9 = por %p4105_p8, %p4104_p5 }
  0x5b   : > { %p4107_p11 = pnand %p4106_p9, %p4100_p7 }
  0x5d   : > { %4110 = shalt.err (!%p4107_p11)  }
  0x5e   : > { %s4111_s28 = scalar_lea.vmem %s212_s29, 2112  ;;  %s4115_s15 = scalar_lea.vmem %s212_s29, 4224 }
  0x5f   : > { %p4112_p0 = scmp.ne.s32.totalorder %s212_s29, %s4111_s28  ;;  %p4116_p1 = scmp.lt.s32.totalorder %s212_s29, %s212_s29 }
  0x60   : > { %p4117_p2 = scmp.lt.s32.totalorder %s4115_s15, %s4111_s28 }
  0x62   : > { %p4118_p6 = por %p4117_p2, %p4116_p1 }
  0x64   : > { %p4119_p10 = pnand %p4118_p6, %p4112_p0 }
  0x66   : > { %4122 = shalt.err (!%p4119_p10)  }
  0x67   : > { %214 = dma.hbm_to_vmem [thread:$0]  %s203_s30, 2112, %s212_s29, [#allocation3] }
  0x68 PF: > { %p217_p4 = scmp.lt.s32.totalorder %s4320_s21, 0  ;;  %s218_s1 = ssub.s32 0, %s4320_s21 }
  0x69   : > { %s2905_s20 = smin.u32 %s4320_s21, %s218_s1 }
  0x6a   : > { %s220_s13 = sand.u32 1, %s2905_s20  }
  0x6b   : > { %s221_s14 = ssub.s32 0, %s220_s13 }
  0x6c   : > { %s5405_s14 = smov (!%p217_p4, %s221_s14), %s220_s13 }
  0x6d   : > { %p2907_p3 = scmp.lt.s32.totalorder %s5405_s14, 0  ;;  %s227_s23 = sadd.s32 2, %s5405_s14 }
  0x6f   : > { %s5407_s23 = smov (!%p2907_p3, %s227_s23), %s5405_s14 }
  0x70   : > { %s3042_s7 = smul.u32 132, %s5407_s23  ;;  %s232_s24 = scalar_lea.sflag [#allocation3], %s5407_s23 }
  0x72   : > { %s4554_s8 = scalar_lea.vmem [#allocation2], %s3042_s7 }
  0x73   : > { %4284 = dma.done.wait %s232_s24, 2112 }
  0x74   : > { %4285 = vsyncadd %s232_s24, 4294965184  ;;  %s238_s29 = sadd.s32 1, %s4320_s21  ;;  %s243_s30 = ssub.s32 1, %s5407_s23  ;;  %v3969_v1 = vld [vmem:[#allocation4 + $0xc0] sm:$0xff]   ;;  %v3971_v3 = vld [vmem:[#allocation4 + $0xc8] sm:$0xff]  }
  0x75   : > { %s2811_s28 = smul.u32 24, %s4320_s21  ;;  %p4559_p7 = scmp.lt.s32.totalorder %s238_s29, 2  ;;  %v3970_v2 = vld [vmem:[#allocation4 + $0x100] sm:$0xff]   ;;  %3288 = vmatprep.subr.bf16.mxu1 %v3969_v1 }
  0x76   : > { %s2812_s15 = smul.u32 57, %s4324_s22  ;;  %s253_s23 = scalar_lea.sflag [#allocation3], %s243_s30 }
  0x77   : > { %s3043_s20 = smul.u32 132, %s243_s30 }
  0x78   : > { %s2813_s13 = sadd.s32 %s2812_s15, %s2811_s28 }
  0x79   : > { %s2910_s14 = sshll.u32 %s2813_s13, 6  ;;  %s252_s16 = scalar_lea.vmem [#allocation2], %s3043_s20 }
  0x7a   : > { %s2815_s24 = scalar_lea.hbm %s5334_s0, %s2910_s14  ;;  %s261_s27 = sshll.u32 %s252_s16, 4  ;;  %s4568_s27 = int_to_ptr.vmem [resolvable:$true] %s261_s27 }
  0x7b   : > { %s4566_s9 = scalar_lea.hbm %s2815_s24, 1536  ;;  %s4151_s29 = scalar_lea.hbm %s2815_s24, 3648 }
  0x7c   : > { %p4124_p12 = scmp.ne.s32.totalorder %s4566_s9, %s4151_s29  ;;  %s4127_s16 = scalar_lea.hbm %s5334_s0, 7296 }
  0x7d   : > { %p4128_p8 = scmp.lt.u32.totalorder %s4566_s9, %s5334_s0  ;;  %p4129_p9 = scmp.lt.u32.totalorder %s4127_s16, %s4151_s29 }
  0x7e   : > { %p4125_p13 = pnand %p4124_p12, %p4559_p7  ;;  %p4131_p0 = scmp.lt.u32.totalorder %s4151_s29, %s4566_s9 }
  0x7f   : > { %p4130_p11 = por %p4129_p9, %p4128_p8 }
  0x80   : > { %p4126_p5 = pneg %p4125_p13 }
  0x81   : > { %p4132_p1 = por %p4131_p0, %p4130_p11 }
  0x83   : > { %p4133_p2 = pnand %p4132_p1, %p4126_p5 }
  0x85   : > { %4136 = shalt.err (!%p4133_p2)  }
  0x86   : > { %s4137_s30 = scalar_lea.vmem %s4568_s27, 2112  ;;  %s4343_s13 = smov [#allocation2]  }
  0x87   : > { %p4138_p6 = scmp.ne.s32.totalorder %s4568_s27, %s4137_s30  ;;  %s4141_s14 = sshll.u32 %s4343_s13, 4  ;;  %s4142_s14 = int_to_ptr.vmem [resolvable:$false] %s4141_s14 }
  0x88   : > { %s4143_s7 = scalar_lea.vmem %s4142_s14, 4224  ;;  %p4144_p3 = scmp.lt.s32.totalorder %s4568_s27, %s4142_s14 }
  0x89   : > { %p4139_p10 = pnand %p4138_p6, %p4559_p7  ;;  %p4145_p12 = scmp.lt.s32.totalorder %s4143_s7, %s4137_s30 }
  0x8b   : > { %p4140_p4 = pneg %p4139_p10  ;;  %p4146_p13 = por %p4145_p12, %p4144_p3 }
  0x8d   : > { %p4147_p8 = pnand %p4146_p13, %p4140_p4 }
  0x8f   : > { %4150 = shalt.err (!%p4147_p8)  }
  0x90   : > { %3849 = dma.hbm_to_vmem [thread:$0]  (%p4559_p7), %s4566_s9, 2112, %s4568_s27, %s253_s23  ;;  %3448 = vmatprep.subr.bf16.mxu0 %v3970_v2  ;;  %3289 = vmatpush3.bf16.msra.mxu1 %v3969_v1  ;;  %v3972_v4 = vld [vmem:[#allocation4 + $0x108] sm:$0xff]   ;;  %v3973_v5 = vld [vmem:[#allocation4 + $0xd0] sm:$0xff]   ;;  %v3975_v7 = vld [vmem:[#allocation4 + $0xd8] sm:$0xff]   ;;  %vm1001_vm0 = vsmask.f32 7424 }
  0x91   : > { %3449 = vmatpush3.bf16.msra.mxu0 %v3970_v2  ;;  %3290 = vmatprep.subr.bf16.mxu1 %v3971_v3  ;;  %v3974_v6 = vld [vmem:[#allocation4 + $0x110] sm:$0xff]   ;;  %v3976_v8 = vld [vmem:[#allocation4 + $0x118] sm:$0xff]   ;;  %v3977_v9 = vld [vmem:[#allocation4 + $0xe0] sm:$0xff]   ;;  %vm1869_vm1 = vcmask 1046528   ;;  %s3060_s27 = sshll.u32 %s4320_s21, 4  ;;  %s3033_s9 = sshll.u32 %s4324_s22, 5 }
  0x92   : > { %3450 = vmatprep.subr.bf16.mxu0 %v3972_v4  ;;  %v3978_v10 = vld [vmem:[#allocation4 + $0x120] sm:$0xff]   ;;  %v3979_v11 = vld [vmem:[#allocation4 + $0xe8] sm:$0xff]   ;;  %v4604_v17 = vld [vmem:[%s4554_s8 + $0x18] sm:$0xf]  ;;  %s2714_s1 = sshll.u32 %s4532_s11, 4  ;;  %s5378_s17 = sand.u32 1, %s4312_s19   ;;  %s5174_s1 = int_to_ptr.vmem [resolvable:$true] %s2714_s1 }
  0x93   : > { %v3980_v12 = vld [vmem:[#allocation4 + $0x128] sm:$0xff]   ;;  %v4607_v18 = vld [vmem:[%s4554_s8 + $0x1c] sm:$0xf]  ;;  %v4614_v20 = vld [vmem:[%s4554_s8 + $0x20] sm:$0xf]  ;;  %s5180_s28 = scalar_lea.sflag [#allocation6], %s5378_s17 }
  0x94   : > { %3291 = vmatpush3.bf16.msra.mxu1 %v3971_v3  ;;  %v4591_v13 = vld [vmem:[%s4554_s8 + $0xc] sm:$0xf]  ;;  %v4594_v14 = vld [vmem:[%s4554_s8 + $0x10] sm:$0xf]  ;;  %v4601_v16 = vld [vmem:[%s4554_s8 + $0x14] sm:$0xf]  ;;  %v4621_v23 = vcombine.low %v4607_v18, %v4614_v20 }
  0x95   : > { %3451 = vmatpush3.bf16.msra.mxu0 %v3972_v4  ;;  %3292 = vmatprep.subr.bf16.mxu1 %v3973_v5  ;;  %v4598_v15 = vcombine.low %v4591_v13, %v4594_v14  ;;  %v4611_v19 = vcombine.low %v4601_v16, %v4604_v17  ;;  %v3981_v24 = vld [vmem:[#allocation4 + $0xf0] sm:$0xff]   ;;  %v4625_v26 = vld [vmem:[%s4554_s8 + $0x24] sm:$0xf]  ;;  %v4628_v29 = vld [vmem:[%s4554_s8 + $0x28] sm:$0xf]  ;;  %s4152_s16 = scalar_lea.vmem %s5174_s1, 1024 }
  0x96   : > { %3452 = vmatprep.subr.bf16.mxu0 %v3974_v6  ;;  %v3982_v27 = vld [vmem:[#allocation4 + $0x130] sm:$0xff]   ;;  %v4632_v31 = vcombine.low %v4625_v26, %v4628_v29  ;;  %v4635_v32 = vld [vmem:[%s4554_s8 + $0x2c] sm:$0xf]  ;;  %v4638_v33 = vld [vmem:[%s4554_s8 + $0x30] sm:$0xf]  ;;  %v1333_v36 = vshll.u32 %v4621_v23, 16  ;;  %p4153_p7 = scmp.ne.s32.totalorder %s5174_s1, %s4152_s16 }
  0x97   : > { %3304 = vmatprep.mubr.bf16.mxu1 %v4598_v15  ;;  %v1318_v21 = vshrl.u32 %v4598_v15, 16  ;;  %v1320_v22 = vshll.u32 %v4598_v15, 16  ;;  %v1325_v25 = vshll.u32 %v4611_v19, 16  ;;  %v3983_v34 = vld [vmem:[#allocation4 + $0xf8] sm:$0xff]   ;;  %v1329_v38 = vshrl.u32 %v4611_v19, 16  ;;  %v3999_v48 = vld [vmem:[#allocation4] sm:$0xff]  }
  0x98   : > { %3293 = vmatpush3.bf16.msra.mxu1 %v3973_v5  ;;  %v3984_v37 = vld [vmem:[#allocation4 + $0x138] sm:$0xff]   ;;  %v4643_v39 = vld [vmem:[%s4554_s8 + $0x34] sm:$0xf]  ;;  %v4646_v40 = vld [vmem:[%s4554_s8 + $0x38] sm:$0xf]  ;;  %v1337_v42 = vshrl.u32 %v4621_v23, 16  ;;  %v4653_v44 = vcombine.low %v4635_v32, %v4638_v33 }
  0x99   : > { %3453 = vmatpush3.bf16.msra.mxu0 %v3974_v6  ;;  %3294 = vmatprep.subr.bf16.mxu1 %v3975_v7  ;;  %v1322_v28 = vrot.slane %v1320_v22, 1  ;;  %v1327_v30 = vrot.slane %v1325_v25, 1  ;;  %v1341_v43 = vshll.u32 %v4632_v31, 16  ;;  %v1335_v45 = vrot.slane %v1333_v36, 1  ;;  %v3990_v49 = vld [vmem:[#allocation4 + $0x1c0] sm:$0xff]   ;;  %v3991_v55 = vld [vmem:[#allocation4 + $0x1c8] sm:$0xff]  }
  0x9a   : > { %3454 = vmatprep.subr.bf16.mxu0 %v3976_v8  ;;  %v4657_v46 = vcombine.low %v4643_v39, %v4646_v40  ;;  %v1345_v52 = vshrl.u32 %v4632_v31, 16  ;;  %v1349_v53 = vshll.u32 %v4653_v44, 16  ;;  %v4662_v54 = vld [vmem:[%s4554_s8 + $0x3c] sm:$0xf]  ;;  %v1353_v56 = vshrl.u32 %v4653_v44, 16  ;;  %v4003_v63 = vld [vmem:[#allocation4 + $0x8] sm:$0xff]  }
  0x9b   : > { %v1323_v35 = vor.u32 %v1322_v28, %v1318_v21  ;;  %v1331_v47 = vor.u32 %v1329_v38, %v1327_v30  ;;  %v1339_v50 = vor.u32 %v1337_v42, %v1335_v45  ;;  %v1343_v51 = vrot.slane %v1341_v43, 1  ;;  %v4667_v58 = vld [vmem:[%s4554_s8 + $0x40] sm:$0xf]  ;;  %v4670_v59 = vld [vmem:[%s4554_s8 + $0x44] sm:$0xf]  ;;  %v3996_v4 = vld [vmem:[#allocation4 + $0x1d0] sm:$0xff]  }
  0x9c   : > { %3295 = vmatpush3.bf16.msra.mxu1 %v3975_v7  ;;  %v1357_v57 = vshll.u32 %v4657_v46, 16  ;;  %v4674_v61 = vld [vmem:[%s4554_s8 + $0x48] sm:$0xf]  ;;  %v1351_v0 = vrot.slane %v1349_v53, 1  ;;  %v4681_v1 = vcombine.low %v4662_v54, %v4667_v58  ;;  %v4006_v7 = vld [vmem:[#allocation4 + $0x10] sm:$0xff]   ;;  %p5379_p5 = scmp.ne.s32.totalorder %s5361_s6, 0 }
  0x9d   : > { %3455 = vmatpush3.bf16.msra.mxu0 %v3976_v8  ;;  %3296 = vmatprep.subr.bf16.mxu1 %v3977_v9  ;;  %v1328_v41 = vsel %vm1001_vm0, %v1323_v35, %v1327_v30  ;;  %v1336_v60 = vsel %vm1001_vm0, %v1331_v47, %v1335_v45  ;;  %v1344_v62 = vsel %vm1001_vm0, %v1339_v50, %v1343_v51  ;;  %v1361_v8 = vshrl.u32 %v4657_v46, 16  ;;  %v4699_v25 = vld [vmem:[%s4554_s8 + $0x54] sm:$0xf]  ;;  %v4703_v28 = vld [vmem:[%s4554_s8 + $0x58] sm:$0xf]  ;;  %v4009_v43 = vld [vmem:[#allocation4 + $0x1e0] sm:$0xff]  }
  0x9e   : > { %3456 = vmatprep.subr.bf16.mxu0 %v3978_v10  ;;  %3464 = vmatprep.mubr.bf16.mxu0 %v1328_v41  ;;  %v1347_v2 = vor.u32 %v1345_v52, %v1343_v51  ;;  %v4685_v3 = vcombine.low %v4670_v59, %v4674_v61  ;;  %v1355_v5 = vor.u32 %v1353_v56, %v1351_v0  ;;  %v1359_v6 = vrot.slane %v1357_v57, 1  ;;  %v4014_v47 = vld [vmem:[#allocation4 + $0x20] sm:$0xff]   ;;  %v4721_v50 = vld [vmem:[%s4554_s8 + $0x60] sm:$0xf]  ;;  %p4154_p9 = pnand %p4153_p7, %p5379_p5  ;;  %s4344_s15 = smov [#allocation7]  }
  0x9f   : > { %v1369_v22 = vshrl.u32 %v4681_v1, 16  ;;  %v4731_v57 = vld [vmem:[%s4554_s8 + $0x68] sm:$0xf]  ;;  %s4156_s20 = sshll.u32 %s4344_s15, 4  ;;  %s4157_s20 = int_to_ptr.vmem [resolvable:$false] %s4156_s20 }
  0xa0   : > { %3297 = vmatpush3.bf16.msra.mxu1 %v3977_v9  ;;  %v1365_v9 = vshll.u32 %v4681_v1, 16  ;;  %v1352_v21 = vsel %vm1001_vm0, %v1347_v2, %v1351_v0  ;;  %v1363_v36 = vor.u32 %v1361_v8, %v1359_v6  ;;  %v1377_v42 = vshrl.u32 %v4685_v3, 16  ;;  %v4020_v8 = vld [vmem:[#allocation4 + $0x30] sm:$0xff]   ;;  %p4155_p11 = pneg %p4154_p9  ;;  %s4158_s30 = scalar_lea.vmem %s4157_s20, 2048 }
  0xa1   : > { %3457 = vmatpush3.bf16.msra.mxu0 %v3978_v10  ;;  %3298 = vmatprep.subr.bf16.mxu1 %v3979_v11  ;;  %v4002_v10 = vld [vmem:[#allocation4 + $0x1d8] sm:$0xff]   ;;  %p4159_p0 = scmp.lt.s32.totalorder %s5174_s1, %s4157_s20  ;;  %p4160_p1 = scmp.lt.s32.totalorder %s4158_s30, %s4152_s16 }
  0xa2   : > { %3458 = vmatprep.subr.bf16.mxu0 %v3980_v12  ;;  %v1367_v35 = vrot.slane %v1365_v9, 1  ;;  %v4745_v9 = vld [vmem:[%s4554_s8 + $0x6c] sm:$0xf] }
  0xa3   : > { %p4161_p2 = por %p4160_p1, %p4159_p0 }
  0xa4   : > { %3299 = vmatpush3.bf16.msra.mxu1 %v3979_v11  ;;  %v4690_v11 = vld [vmem:[%s4554_s8 + $0x4c] sm:$0xf]  ;;  %v1371_v38 = vor.u32 %v1369_v22, %v1367_v35  ;;  %v1368_v51 = vsel %vm1001_vm0, %v1363_v36, %v1367_v35  ;;  %v4023_v35 = vld [vmem:[#allocation4 + $0x1f8] sm:$0xff]  }
  0xa5   : > { %3459 = vmatpush3.bf16.msra.mxu0 %v3980_v12  ;;  %3300 = vmatprep.subr.bf16.mxu1 %v3981_v24  ;;  %v4693_v12 = vld [vmem:[%s4554_s8 + $0x50] sm:$0xf]  ;;  %v4024_v36 = vld [vmem:[#allocation4 + $0x38] sm:$0xff]   ;;  %p4162_p6 = pnand %p4161_p2, %p4155_p11 }
  0xa6   : > { %3460 = vmatprep.subr.bf16.mxu0 %v3982_v27  ;;  %v4708_v30 = vcombine.low %v4690_v11, %v4693_v12 }
  0xa8   : > { %3301 = vmatpush3.bf16.msra.mxu1 %v3981_v24  ;;  %v1373_v24 = vshll.u32 %v4685_v3, 16  ;;  %v1381_v45 = vshll.u32 %v4708_v30, 16  ;;  %v1385_v52 = vshrl.u32 %v4708_v30, 16 }
  0xa9   : > { %3461 = vmatpush3.bf16.msra.mxu0 %v3982_v27  ;;  %3302 = vmatprep.subr.bf16.mxu1 %v3983_v34  ;;  %v1360_v27 = vsel %vm1001_vm0, %v1355_v5, %v1359_v6  ;;  %v4018_v6 = vld [vmem:[#allocation4 + $0x1f0] sm:$0xff]  }
  0xaa   : > { %3462 = vmatprep.subr.bf16.mxu0 %v3984_v37  ;;  %v1375_v41 = vrot.slane %v1373_v24, 1  ;;  %v4752_v24 = vcombine.low %v4604_v17, %v4607_v18  ;;  %v4760_v18 = vcombine.low %v4745_v9, %v4745_v9 }
  0xac   : > { %3303 = vmatpush3.bf16.msra.mxu1 %v3983_v34  ;;  %v4010_v34 = vld [vmem:[#allocation4 + $0x18] sm:$0xff]   ;;  %v1376_v56 = vsel %vm1001_vm0, %v1371_v38, %v1375_v41  ;;  %v1379_v0 = vor.u32 %v1377_v42, %v1375_v41  ;;  %v4764_v42 = vcombine.low %v4614_v20, %v4625_v26  ;;  %v1030_v20 = vshrl.u32 %v4752_v24, 16 }
  0xad   : > { %3463 = vmatpush3.bf16.msra.mxu0 %v3984_v37  ;;  %3328 = vmatprep.subr.bf16.mxu1 %v3999_v48  ;;  %v4713_v37 = vcombine.low %v4699_v25, %v4703_v28  ;;  %v4777_v26 = vcombine.low %v4628_v29, %v4635_v32  ;;  %v4793_v29 = vcombine.low %v4646_v40, %v4662_v54 }
  0xae   : > { %3488 = vmatprep.subr.bf16.mxu0 %v3990_v49  ;;  %v1038_v54 = vshrl.u32 %v4764_v42, 16 }
  0xaf   : > { %3305 = vmatmul.mubr.bf16.vlgmr.msra.gmra.mrb[0].mxu1 %v4611_v19  ;;  %v1389_v53 = vshll.u32 %v4713_v37, 16 }
  0xb0   : > { %3465 = vmatmul.mubr.bf16.vlgmr.msra.gmra.mrb[0].mxu0 %v1336_v60  ;;  %3308 = vmatprep.mubr.bf16.mxu1 %v4621_v23 }
  0xb1   : > { %3489 = vmatpush3.bf16.msra.mxu0 %v3990_v49  ;;  %3468 = vmatprep.mubr.bf16.mxu0 %v1344_v62  ;;  %v4011_v49 = vld [vmem:[#allocation4 + $0x1e8] sm:$0xff]   ;;  %v1391_v5 = vrot.slane %v1389_v53, 1  ;;  %v1413_v53 = vshll.u32 %v4760_v18, 16 }
  0xb2   : > { %3490 = vmatprep.subr.bf16.mxu0 %v3991_v55  ;;  %3329 = vmatpush3.bf16.msra.mxu1 %v3999_v48  ;;  %v4718_v48 = vld [vmem:[%s4554_s8 + $0x5c] sm:$0xf]  ;;  %v4017_v62 = vld [vmem:[#allocation4 + $0x28] sm:$0xff]  }
  0xb3   : > { %3330 = vmatprep.subr.bf16.mxu1 %v4003_v63  ;;  %v4736_v60 = vcombine.low %v4718_v48, %v4721_v50 }
  0xb5   : > { %3491 = vmatpush3.bf16.msra.mxu0 %v3991_v55  ;;  %v4727_v55 = vld [vmem:[%s4554_s8 + $0x64] sm:$0xf] }
  0xb6   : > { %3492 = vmatprep.subr.bf16.mxu0 %v3996_v4  ;;  %3331 = vmatpush3.bf16.msra.mxu1 %v4003_v63  ;;  %v1383_v63 = vrot.slane %v1381_v45, 1  ;;  %v4741_v2 = vcombine.low %v4727_v55, %v4731_v57  ;;  %v1026_v45 = vshll.u32 %v4752_v24, 16 }
  0xb7   : > { %3309 = vmatmul.mubr.bf16.gmra.mrb[4].mxu1 %v4632_v31  ;;  %3332 = vmatprep.subr.bf16.mxu1 %v4006_v7 }
  0xb8   : > { %3469 = vmatmul.mubr.bf16.gmra.mrb[4].mxu0 %v1352_v21  ;;  %3312 = vmatprep.mubr.bf16.mxu1 %v4653_v44  ;;  %v1393_v21 = vshrl.u32 %v4713_v37, 16  ;;  %v1405_v22 = vshll.u32 %v4741_v2, 16 }
  0xb9   : > { %3493 = vmatpush3.bf16.msra.mxu0 %v3996_v4  ;;  %3472 = vmatprep.mubr.bf16.mxu0 %v1360_v27  ;;  %v1387_v4 = vor.u32 %v1385_v52, %v1383_v63 }
  0xba   : > { %3494 = vmatprep.subr.bf16.mxu0 %v4002_v10  ;;  %3333 = vmatpush3.bf16.msra.mxu1 %v4006_v7  ;;  %v1397_v7 = vshll.u32 %v4736_v60, 16  ;;  %v1395_v41 = vor.u32 %v1393_v21, %v1391_v5  ;;  %v1407_v17 = vrot.slane %v1405_v22, 1  ;;  %v1058_v21 = vshll.u32 %v4793_v29, 16 }
  0xbb   : > { %3334 = vmatprep.subr.bf16.mxu1 %v4010_v34  ;;  %v1392_v27 = vsel %vm1001_vm0, %v1387_v4, %v1391_v5  ;;  %v1415_v4 = vrot.slane %v1413_v53, 1  ;;  %v4811_v22 = vcombine.low %v4674_v61, %v4690_v11  ;;  %v1062_v61 = vshrl.u32 %v4793_v29, 16 }
  0xbc   : > { %v1399_v38 = vrot.slane %v1397_v7, 1 }
  0xbd   : > { %3495 = vmatpush3.bf16.msra.mxu0 %v4002_v10  ;;  %v1384_v10 = vsel %vm1001_vm0, %v1379_v0, %v1383_v63  ;;  %v1034_v63 = vshll.u32 %v4764_v42, 16  ;;  %v4786_v0 = vcombine.low %v4638_v33, %v4643_v39  ;;  %v1042_v33 = vshll.u32 %v4777_v26, 16  ;;  %v267_v39 = vld [vmem:[%s4554_s8 + $0x8] sm:$0xf] }
  0xbe   : > { %3496 = vmatprep.subr.bf16.mxu0 %v4009_v43  ;;  %3335 = vmatpush3.bf16.msra.mxu1 %v4010_v34  ;;  %v1401_v34 = vshrl.u32 %v4736_v60, 16  ;;  %v1400_v52 = vsel %vm1001_vm0, %v1395_v41, %v1399_v38 }
  0xbf   : > { %3313 = vmatmul.mubr.bf16.gmra.mrb[8].mxu1 %v4657_v46  ;;  %3336 = vmatprep.subr.bf16.mxu1 %v4014_v47  ;;  %v1050_v7 = vshll.u32 %v4786_v0, 16 }
  0xc0   : > { %3473 = vmatmul.mubr.bf16.gmra.mrb[8].mxu0 %v1368_v51  ;;  %3316 = vmatprep.mubr.bf16.mxu1 %v4681_v1  ;;  %v1409_v51 = vshrl.u32 %v4741_v2, 16 }
  0xc1   : > { %3476 = vmatprep.mubr.bf16.mxu0 %v1376_v56  ;;  %3497 = vmatpush3.bf16.msra.mxu0 %v4009_v43  ;;  %v1403_v43 = vor.u32 %v1401_v34, %v1399_v38  ;;  %v1044_v34 = vrot.slane %v1042_v33, 1  ;;  %v4827_v38 = vcombine.low %v4703_v28, %v4718_v48  ;;  %v4027_v48 = vld [vmem:[#allocation4 + $0x88] sm:$0xff]  }
  0xc2   : > { %3498 = vmatprep.subr.bf16.mxu0 %v4011_v49  ;;  %3337 = vmatpush3.bf16.msra.mxu1 %v4014_v47  ;;  %v4767_v47 = vld [vmem:[#allocation4 + $0x80] sm:$0xff]   ;;  %v1411_v32 = vor.u32 %v1409_v51, %v1407_v17  ;;  %v1074_v51 = vshll.u32 %v4811_v22, 16 }
  0xc3   : > { %3338 = vmatprep.subr.bf16.mxu1 %v4017_v62  ;;  %v1408_v56 = vsel %vm1001_vm0, %v1403_v43, %v1407_v17  ;;  %v1060_v17 = vrot.slane %v1058_v21, 1  ;;  %v2109_v21 = vrot.slane %v4598_v15, 1  ;;  %v4029_v15 = vld [vmem:[#allocation4 + $0x90] sm:$0xff]  }
  0xc4   : > { %v1416_v40 = vsel %vm1001_vm0, %v1411_v32, %v1415_v4  ;;  %v1090_v32 = vshll.u32 %v4827_v38, 16  ;;  %v4852_v4 = vcombine.low %v4721_v50, %v4721_v50 }
  0xc5   : > { %3499 = vmatpush3.bf16.msra.mxu0 %v4011_v49  ;;  %v4769_v49 = vld [vmem:[#allocation4 + $0x180] sm:$0xff]  }
  0xc6   : > { %3500 = vmatprep.subr.bf16.mxu0 %v4018_v6  ;;  %3339 = vmatpush3.bf16.msra.mxu1 %v4017_v62  ;;  %v4780_v62 = vrot.slane %v1026_v45, 1 }
  0xc7   : > { %3317 = vmatmul.mubr.bf16.gmra.mrb[12].mxu1 %v4685_v3  ;;  %3340 = vmatprep.subr.bf16.mxu1 %v4020_v8 }
  0xc8   : > { %3477 = vmatmul.mubr.bf16.gmra.mrb[12].mxu0 %v1384_v10  ;;  %3320 = vmatprep.mubr.bf16.mxu1 %v4708_v30  ;;  %v1032_v5 = vor.u32 %v1030_v20, %v4780_v62  ;;  %v4804_v10 = vld [vmem:[%s4554_s8] sm:$0xff]   ;;  %v4841_v20 = vcombine.low %v4594_v14, %v4601_v16 }
  0xc9   : > { %3480 = vmatprep.mubr.bf16.mxu0 %v1392_v27  ;;  %3501 = vmatpush3.bf16.msra.mxu0 %v4018_v6  ;;  %v1036_v6 = vrot.slane %v1034_v63, 1  ;;  %v1003_v53 = vshrl.u32 %v4804_v10, 16  ;;  %v1005_v28 = vshll.u32 %v4804_v10, 16 }
  0xca   : > { %3341 = vmatpush3.bf16.msra.mxu1 %v4020_v8  ;;  %3502 = vmatprep.subr.bf16.mxu0 %v4023_v35  ;;  %v4801_v8 = vcombine.low %v4667_v58, %v4670_v59  ;;  %v1052_v58 = vrot.slane %v1050_v7, 1  ;;  %v1054_v59 = vshrl.u32 %v4786_v0, 16  ;;  %v4859_v7 = vrot.slane %v1074_v51, 1 }
  0xcb   : > { %3342 = vmatprep.subr.bf16.mxu1 %v4024_v36  ;;  %v4814_v27 = vsel %vm1001_vm0, %v1032_v5, %v1036_v6  ;;  %v1040_v41 = vor.u32 %v1038_v54, %v1036_v6  ;;  %v1007_v5 = vrot.slane %v1005_v28, 1  ;;  %v2114_v51 = vrot.slane %v4632_v31, 1 }
  0xcc   : > { %v1066_v11 = vshll.u32 %v4801_v8, 16  ;;  %v1070_v43 = vshrl.u32 %v4801_v8, 16  ;;  %v1056_v14 = vor.u32 %v1054_v59, %v1052_v58  ;;  %v4870_v59 = vrot.slane %v1090_v32, 1  ;;  %v4031_v32 = vld [vmem:[#allocation4 + $0x98] sm:$0xff]  }
  0xcd   : > { %3503 = vmatpush3.bf16.msra.mxu0 %v4023_v35  ;;  %v1046_v35 = vshrl.u32 %v4777_v26, 16  ;;  %v2120_v31 = vrot.slane %v4681_v1, 1 }
  0xce   : > { %3343 = vmatpush3.bf16.msra.mxu1 %v4024_v36  ;;  %3528 = vmatprep.subr.bf16.mxu0 %v4767_v47  ;;  %v4820_v36 = vcombine.low %v267_v39, %v4591_v13  ;;  %v4833_v13 = vcombine.low %v4693_v12, %v4699_v25  ;;  %v4847_v12 = vsel %vm1001_vm0, %v1040_v41, %v1044_v34  ;;  %v4032_v25 = vld [vmem:[#allocation4 + $0x188] sm:$0xff]   ;;  %v1022_v41 = vshrl.u32 %v4841_v20, 16 }
  0xcf   : > { %3321 = vmatmul.mubr.bf16.gmra.mrb[16].mxu1 %v4713_v37  ;;  %3368 = vmatprep.subr.bf16.mxu1 %v4769_v49  ;;  %v1048_v45 = vor.u32 %v1046_v35, %v1044_v34  ;;  %v1064_v39 = vor.u32 %v1062_v61, %v1060_v17  ;;  %v2110_v34 = vrot.slane %v4611_v19, 1  ;;  %v1018_v35 = vshll.u32 %v4841_v20, 16  ;;  %v4033_v19 = vld [vmem:[#allocation4 + $0x190] sm:$0xff]  }
  0xd0   : > { %3481 = vmatmul.mubr.bf16.gmra.mrb[16].mxu0 %v1400_v52  ;;  %3324 = vmatprep.mubr.bf16.mxu1 %v4736_v60  ;;  %v1078_v52 = vshrl.u32 %v4811_v22, 16  ;;  %v1010_v63 = vshll.u32 %v4820_v36, 16  ;;  %v1082_v16 = vshll.u32 %v4833_v13, 16  ;;  %v1014_v54 = vshrl.u32 %v4820_v36, 16 }
  0xd1   : > { %3484 = vmatprep.mubr.bf16.mxu0 %v1408_v56  ;;  %v4843_v56 = vrot.slane %v1066_v11, 1  ;;  %v4855_v6 = vsel %vm1001_vm0, %v1048_v45, %v1052_v58  ;;  %v2112_v58 = vrot.slane %v4621_v23, 1  ;;  %v4878_v45 = vsel %vm1869_vm1, %v2109_v21, %v2110_v34  ;;  %v4035_v21 = vld [vmem:[#allocation4 + $0x198] sm:$0xff]  }
  0xd2   : > { %v1012_v33 = vrot.slane %v1010_v63, 1  ;;  %v1020_v23 = vrot.slane %v1018_v35, 1  ;;  %v2118_v63 = vrot.slane %v4657_v46, 1  ;;  %v2124_v46 = vrot.slane %v4708_v30, 1 }
  0xd3   : > { %v4889_v28 = vsel %vm1001_vm0, %v1064_v39, %v4843_v56  ;;  %v1094_v39 = vshrl.u32 %v4827_v38, 16  ;;  %v1080_v35 = vor.u32 %v1078_v52, %v4859_v7  ;;  %v4038_v52 = vld [vmem:[#allocation4 + $0x1a0] sm:$0xff]  }
  0xd4   : > { %v1016_v11 = vor.u32 %v1014_v54, %v1012_v33  ;;  %v4914_v1 = vsel %vm1869_vm1, %v2118_v63, %v2120_v31 }
  0xd7   : > { %3325 = vmatmul.mubr.bf16.gmra.mrb[20].mxu1 %v4741_v2 }
  0xd8   : > { %3485 = vmatmul.mubr.bf16.gmra.mrb[20].mxu0 %v1416_v40  ;;  %3344 = vmatprep.mubr.bf16.mxu1 %v4804_v10  ;;  %v1008_v40 = vor.u32 %v1007_v5, %v1003_v53  ;;  %v4885_v53 = vsel %vm1001_vm0, %v1056_v14, %v1060_v17  ;;  %v4894_v5 = vsel %vm1001_vm0, %v1016_v11, %v1020_v23  ;;  %v4034_v11 = vld [vmem:[#allocation4 + $0xa0] sm:$0xff]  }
  0xd9   : > { %3504 = vmatprep.mubr.bf16.mxu0 %v4814_v27 }
  0xda   : > { %v4873_v61 = vsel %vm1001_vm0, %v1008_v40, %v1012_v33  ;;  %v1024_v33 = vor.u32 %v1022_v41, %v1020_v23  ;;  %v4897_v40 = vsel %vm1869_vm1, %v2112_v58, %v2114_v51 }
  0xdc   : > { %v4911_v54 = vsel %vm1001_vm0, %v1024_v33, %v4780_v62  ;;  %v2128_v62 = vrot.slane %v4736_v60, 1  ;;  %v1072_v60 = vor.u32 %v1070_v43, %v4843_v56  ;;  %v4977_v33 = vrot.slane %v4827_v38, 1 }
  0xdf   : > { %3345 = vmatmul.mubr.bf16.vlgmr.msra.gmra.mrb[0].mxu1 %v4820_v36 }
  0xe0   : > { %3505 = vmatmul.mubr.bf16.vlgmr.msra.gmra.mrb[0].mxu0 %v4847_v12  ;;  %3348 = vmatprep.mubr.bf16.mxu1 %v4841_v20 }
  0xe1   : > { %3529 = vmatpush3.bf16.msra.mxu0 %v4767_v47  ;;  %3508 = vmatprep.mubr.bf16.mxu0 %v4855_v6  ;;  %v4881_v47 = vsel %vm1869_vm1, %v2110_v34, %v2112_v58  ;;  %v2130_v34 = vrot.slane %v4741_v2, 1  ;;  %v1084_v58 = vrot.slane %v1082_v16, 1  ;;  %v4961_v16 = vsel %vm1001_vm0, %v1072_v60, %v4859_v7  ;;  %v4044_v60 = vld [vmem:[#allocation4 + $0xb8] sm:$0xff]  }
  0xe2   : > { %3530 = vmatprep.subr.bf16.mxu0 %v4027_v48  ;;  %3369 = vmatpush3.bf16.msra.mxu1 %v4769_v49  ;;  %v2116_v49 = vrot.slane %v4653_v44, 1  ;;  %v2122_v44 = vrot.slane %v4685_v3, 1  ;;  %v4920_v3 = vcombine.low %v4721_v50, %v4727_v55  ;;  %v1098_v50 = vshll.u32 %v4852_v4, 16 }
  0xe3   : > { %3370 = vmatprep.subr.bf16.mxu1 %v4032_v25  ;;  %v2132_v55 = vrot.slane %v4760_v18, 1  ;;  %v1096_v18 = vor.u32 %v1094_v39, %v4870_v59  ;;  %v4951_v41 = vsel %vm1869_vm1, %v2128_v62, %v2130_v34  ;;  %v4965_v23 = vsel %vm1001_vm0, %v1080_v35, %v1084_v58  ;;  %v4981_v39 = vld [vmem:[%s4554_s8 + $0x70] sm:$0xff]   ;;  %v4045_v35 = vld [vmem:[#allocation4 + $0x1b8] sm:$0xff]  }
  0xe4   : > { %v4901_v17 = vsel %vm1869_vm1, %v2114_v51, %v2116_v49  ;;  %v4904_v14 = vsel %vm1869_vm1, %v2116_v49, %v2118_v63  ;;  %v4923_v30 = vsel %vm1869_vm1, %v2120_v31, %v2122_v44  ;;  %v4036_v51 = vld [vmem:[#allocation4 + $0xa8] sm:$0xff]   ;;  %v1635_v49 = vshll.u32 %v4920_v3, 16 }
  0xe5   : > { %3531 = vmatpush3.bf16.msra.mxu0 %v4027_v48  ;;  %v2126_v48 = vrot.slane %v4713_v37, 1  ;;  %v4954_v43 = vsel %vm1869_vm1, %v2130_v34, %v2132_v55  ;;  %v4039_v63 = vld [vmem:[#allocation4 + $0x1a8] sm:$0xff]   ;;  %v4971_v7 = vcombine.low %v4731_v57, %v4745_v9  ;;  %v2348_v31 = vrot.slane %v4920_v3, 1  ;;  %v4042_v57 = vld [vmem:[#allocation4 + $0x1b0] sm:$0xff]  }
  0xe6   : > { %3532 = vmatprep.subr.bf16.mxu0 %v4029_v15  ;;  %3371 = vmatpush3.bf16.msra.mxu1 %v4032_v25  ;;  %v4926_v25 = vsel %vm1869_vm1, %v2122_v44, %v2124_v46  ;;  %v1637_v44 = vrot.slane %v1635_v49, 1  ;;  %v1651_v55 = vshll.u32 %v4981_v39, 16 }
  0xe7   : > { %3349 = vmatmul.mubr.bf16.gmra.mrb[4].mxu1 %v4752_v24  ;;  %3372 = vmatprep.subr.bf16.mxu1 %v4033_v19  ;;  %v4932_v37 = vsel %vm1869_vm1, %v2124_v46, %v2126_v48  ;;  %v4947_v2 = vsel %vm1869_vm1, %v2126_v48, %v2128_v62  ;;  %v4040_v46 = vld [vmem:[#allocation4 + $0xb0] sm:$0xff]   ;;  %v4987_v9 = vsel %vm1869_vm1, %v4977_v33, %v2348_v31  ;;  %v1643_v48 = vshll.u32 %v4971_v7, 16 }
  0xe8   : > { %3509 = vmatmul.mubr.bf16.gmra.mrb[4].mxu0 %v4885_v53  ;;  %3352 = vmatprep.mubr.bf16.mxu1 %v4764_v42  ;;  %v1639_v62 = vshrl.u32 %v4920_v3, 16  ;;  %v1638_v34 = vsel %vm1001_vm0, %v1096_v18, %v1637_v44 }
  0xe9   : > { %3533 = vmatpush3.bf16.msra.mxu0 %v4029_v15  ;;  %3512 = vmatprep.mubr.bf16.mxu0 %v4889_v28  ;;  %v1100_v15 = vrot.slane %v1098_v50, 1  ;;  %v1647_v50 = vshrl.u32 %v4971_v7, 16 }
  0xea   : > { %3534 = vmatprep.subr.bf16.mxu0 %v4031_v32  ;;  %3373 = vmatpush3.bf16.msra.mxu1 %v4033_v19  ;;  %v1086_v19 = vshrl.u32 %v4833_v13, 16 }
  0xeb   : > { %3374 = vmatprep.subr.bf16.mxu1 %v4035_v21  ;;  %v4957_v56 = vsel %vm1001_vm0, %v1096_v18, %v1100_v15  ;;  %v1653_v15 = vrot.slane %v1651_v55, 1 }
  0xed   : > { %3535 = vmatpush3.bf16.msra.mxu0 %v4031_v32  ;;  %v1088_v32 = vor.u32 %v1086_v19, %v1084_v58  ;;  %v1641_v58 = vor.u32 %v1639_v62, %v1637_v44  ;;  %v4049_v19 = vld [vmem:[#allocation4 + $0x40] sm:$0xff]  }
  0xee   : > { %3536 = vmatprep.subr.bf16.mxu0 %v4034_v11  ;;  %3375 = vmatpush3.bf16.msra.mxu1 %v4035_v21 }
  0xef   : > { %3353 = vmatmul.mubr.bf16.gmra.mrb[8].mxu1 %v4777_v26  ;;  %3376 = vmatprep.subr.bf16.mxu1 %v4038_v52  ;;  %v4992_v21 = vsel %vm1001_vm0, %v1088_v32, %v4870_v59  ;;  %v1645_v59 = vrot.slane %v1643_v48, 1 }
  0xf0   : > { %3513 = vmatmul.mubr.bf16.gmra.mrb[8].mxu0 %v4961_v16  ;;  %3356 = vmatprep.mubr.bf16.mxu1 %v4786_v0 }
  0xf1   : > { %3516 = vmatprep.mubr.bf16.mxu0 %v4965_v23  ;;  %3537 = vmatpush3.bf16.msra.mxu0 %v4034_v11  ;;  %v4043_v11 = vld [vmem:[%s4554_s8 + $0x78] ss:$0 sps:$4 sm:$0xff]   ;;  %v1649_v18 = vor.u32 %v1647_v50, %v1645_v59  ;;  %v1646_v49 = vsel %vm1001_vm0, %v1641_v58, %v1645_v59  ;;  %v1871_v50 = vrot.slane %v4820_v36, 1  ;;  %v1875_v59 = vrot.slane %v4752_v24, 1  ;;  %v4051_v36 = vld [vmem:[#allocation4 + $0x48] sm:$0xff]   ;;  %s2711_s8 = sadd.s32 %s3060_s27, %s3033_s9 }
  0xf2   : > { %3538 = vmatprep.subr.bf16.mxu0 %v4036_v51  ;;  %3377 = vmatpush3.bf16.msra.mxu1 %v4038_v52  ;;  %v4046_v52 = vld [vmem:[#allocation4 + $0x140] sm:$0xff]   ;;  %v1659_v32 = vshll.u32 %v4043_v11, 16  ;;  %v2354_v48 = vrot.slane %v4043_v11, 1  ;;  %v4047_v11 = vld [vmem:[#allocation4 + $0x148] sm:$0xff]   ;;  %s3034_s21 = sshll.u32 %s2711_s8, 6 }
  0xf3   : > { %3378 = vmatprep.subr.bf16.mxu1 %v4039_v63  ;;  %v1654_v44 = vsel %vm1001_vm0, %v1649_v18, %v1653_v15  ;;  %v1877_v18 = vrot.slane %v4764_v42, 1  ;;  %s5172_s29 = scalar_lea.hbm %s5336_s2, %s3034_s21 }
  0xf4   : > { %v1661_v62 = vrot.slane %v1659_v32, 1  ;;  %v4050_v32 = vld [vmem:[#allocation4 + $0x158] sm:$0xff]  }
  0xf5   : > { %3539 = vmatpush3.bf16.msra.mxu0 %v4036_v51  ;;  %v2352_v51 = vrot.slane %v4981_v39, 1 }
  0xf6   : > { %3540 = vmatprep.subr.bf16.mxu0 %v4040_v46  ;;  %3379 = vmatpush3.bf16.msra.mxu1 %v4039_v63  ;;  %v1655_v63 = vshrl.u32 %v4981_v39, 16 }
  0xf7   : > { %3357 = vmatmul.mubr.bf16.gmra.mrb[12].mxu1 %v4793_v29  ;;  %3380 = vmatprep.subr.bf16.mxu1 %v4042_v57 }
  0xf8   : > { %3517 = vmatmul.mubr.bf16.gmra.mrb[12].mxu0 %v4992_v21  ;;  %3360 = vmatprep.mubr.bf16.mxu1 %v4801_v8 }
  0xf9   : > { %3520 = vmatprep.mubr.bf16.mxu0 %v1638_v34  ;;  %3541 = vmatpush3.bf16.msra.mxu0 %v4040_v46  ;;  %v5010_v46 = vsel %vm1869_vm1, %v2352_v51, %v2354_v48  ;;  %v1870_v34 = vrot.slane %v4804_v10, 1  ;;  %v4056_v48 = vld [vmem:[#allocation4 + $0x60] sm:$0xff]  }
  0xfa   : > { %3381 = vmatpush3.bf16.msra.mxu1 %v4042_v57  ;;  %3542 = vmatprep.subr.bf16.mxu0 %v4044_v60  ;;  %v1657_v57 = vor.u32 %v1655_v63, %v1653_v15  ;;  %v4048_v15 = vld [vmem:[#allocation4 + $0x150] sm:$0xff]  }
  0xfb   : > { %3382 = vmatprep.subr.bf16.mxu1 %v4045_v35 }
  0xfc   : > { %v1662_v55 = vsel %vm1001_vm0, %v1657_v57, %v1661_v62  ;;  %v4055_v62 = vld [vmem:[#allocation4 + $0x168] sm:$0xff]  }
  0xfd   : > { %3543 = vmatpush3.bf16.msra.mxu0 %v4044_v60  ;;  %v1872_v60 = vsel %vm1869_vm1, %v1870_v34, %v1871_v50  ;;  %v1887_v34 = vrot.slane %v4811_v22, 1 }
  0xfe   : > { %3383 = vmatpush3.bf16.msra.mxu1 %v4045_v35  ;;  %3568 = vmatprep.subr.bf16.mxu0 %v4046_v52  ;;  %v1873_v35 = vrot.slane %v4841_v20, 1  ;;  %v1879_v20 = vrot.slane %v4777_v26, 1 }
  0xff   : > { %3361 = vmatmul.mubr.bf16.gmra.mrb[16].mxu1 %v4811_v22  ;;  %3408 = vmatprep.subr.bf16.mxu1 %v4049_v19 }
 0x100   : > { %3521 = vmatmul.mubr.bf16.gmra.mrb[16].mxu0 %v1646_v49  ;;  %3364 = vmatprep.mubr.bf16.mxu1 %v4833_v13  ;;  %v1874_v58 = vsel %vm1869_vm1, %v1871_v50, %v1873_v35  ;;  %v1876_v10 = vsel %vm1869_vm1, %v1873_v35, %v1875_v59  ;;  %v5028_v49 = vsel %vm1869_vm1, %v1875_v59, %v1877_v18  ;;  %v4058_v50 = vld [vmem:[#allocation4 + $0x170] sm:$0xff]   ;;  %v4061_v59 = vld [vmem:[#allocation4 + $0x178] sm:$0xff]  }
 0x101   : > { %3524 = vmatprep.mubr.bf16.mxu0 %v1654_v44  ;;  %v5031_v63 = vsel %vm1869_vm1, %v1877_v18, %v1879_v20 }
 0x107   : > { %3365 = vmatmul.mubr.bf16.gmra.mrb[20].mxu1 %v4827_v38 }
 0x108   : > { %3525 = vmatmul.mubr.bf16.gmra.mrb[20].mxu0 %v1662_v55  ;;  %3384 = vmatprep.mubr.bf16.mxu1 %v4752_v24  ;;  %v4052_v24 = vld [vmem:[#allocation4 + $0x50] sm:$0xff]  }
 0x109   : > { %3544 = vmatprep.mubr.bf16.mxu0 %v1872_v60  ;;  %v4059_v55 = vld [vmem:[#allocation4 + $0x70] sm:$0xff]  }
 0x10f   : > { %3385 = vmatmul.mubr.bf16.vlgmr.msra.gmra.mrb[0].mxu1 %v4764_v42  ;;  %v4054_v42 = vld [vmem:[#allocation4 + $0x58] sm:$0xff]  }
 0x110   : > { %3545 = vmatmul.mubr.bf16.vlgmr.msra.gmra.mrb[0].mxu0 %v1874_v58  ;;  %3388 = vmatprep.mubr.bf16.mxu1 %v4777_v26  ;;  %v1881_v26 = vrot.slane %v4786_v0, 1  ;;  %v4063_v58 = vld [vmem:[#allocation4 + $0x200] sm:$0xff]  }
 0x111   : > { %3569 = vmatpush3.bf16.msra.mxu0 %v4046_v52  ;;  %3548 = vmatprep.mubr.bf16.mxu0 %v1876_v10  ;;  %v1883_v52 = vrot.slane %v4793_v29, 1 }
 0x112   : > { %3570 = vmatprep.subr.bf16.mxu0 %v4047_v11  ;;  %3409 = vmatpush3.bf16.msra.mxu1 %v4049_v19  ;;  %v4053_v19 = vld [vmem:[#allocation4 + $0x160] sm:$0xff]   ;;  %v5040_v44 = vsel %vm1869_vm1, %v1879_v20, %v1881_v26 }
 0x113   : > { %3410 = vmatprep.subr.bf16.mxu1 %v4051_v36  ;;  %v5043_v57 = vsel %vm1869_vm1, %v1881_v26, %v1883_v52 }
 0x115   : > { %3571 = vmatpush3.bf16.msra.mxu0 %v4047_v11 }
 0x116   : > { %3572 = vmatprep.subr.bf16.mxu0 %v4048_v15  ;;  %3411 = vmatpush3.bf16.msra.mxu1 %v4051_v36  ;;  %v4064_v36 = vld [vmem:[#allocation4 + $0x208] sm:$0xff]  }
 0x117   : > { %3389 = vmatmul.mubr.bf16.gmra.mrb[4].mxu1 %v4786_v0  ;;  %3412 = vmatprep.subr.bf16.mxu1 %v4052_v24  ;;  %v4057_v0 = vld [vmem:[#allocation4 + $0x68] sm:$0xff]  }
 0x118   : > { %3549 = vmatmul.mubr.bf16.gmra.mrb[4].mxu0 %v5028_v49  ;;  %3392 = vmatprep.mubr.bf16.mxu1 %v4793_v29  ;;  %v1885_v29 = vrot.slane %v4801_v8, 1 }
 0x119   : > { %3573 = vmatpush3.bf16.msra.mxu0 %v4048_v15  ;;  %3552 = vmatprep.mubr.bf16.mxu0 %v5031_v63 }
 0x11a   : > { %3574 = vmatprep.subr.bf16.mxu0 %v4050_v32  ;;  %3413 = vmatpush3.bf16.msra.mxu1 %v4052_v24  ;;  %v5052_v60 = vsel %vm1869_vm1, %v1883_v52, %v1885_v29  ;;  %v5055_v35 = vsel %vm1869_vm1, %v1885_v29, %v1887_v34 }
 0x11b   : > { %3414 = vmatprep.subr.bf16.mxu1 %v4054_v42 }
 0x11d   : > { %3575 = vmatpush3.bf16.msra.mxu0 %v4050_v32 }
 0x11e   : > { %3576 = vmatprep.subr.bf16.mxu0 %v4053_v19  ;;  %3415 = vmatpush3.bf16.msra.mxu1 %v4054_v42 }
 0x11f   : > { %3393 = vmatmul.mubr.bf16.gmra.mrb[8].mxu1 %v4801_v8  ;;  %3416 = vmatprep.subr.bf16.mxu1 %v4056_v48  ;;  %v4062_v8 = vld [vmem:[#allocation4 + $0x78] sm:$0xff]  }
 0x120   : > { %3553 = vmatmul.mubr.bf16.gmra.mrb[8].mxu0 %v5040_v44  ;;  %3396 = vmatprep.mubr.bf16.mxu1 %v4811_v22  ;;  %v1889_v22 = vrot.slane %v4833_v13, 1 }
 0x121   : > { %3556 = vmatprep.mubr.bf16.mxu0 %v5043_v57  ;;  %3577 = vmatpush3.bf16.msra.mxu0 %v4053_v19 }
 0x122   : > { %3578 = vmatprep.subr.bf16.mxu0 %v4055_v62  ;;  %3417 = vmatpush3.bf16.msra.mxu1 %v4056_v48  ;;  %v5063_v11 = vsel %vm1869_vm1, %v1887_v34, %v1889_v22  ;;  %v5067_v10 = vsel %vm1869_vm1, %v1889_v22, %v4977_v33 }
 0x123   : > { %3418 = vmatprep.subr.bf16.mxu1 %v4057_v0 }
 0x125   : > { %3579 = vmatpush3.bf16.msra.mxu0 %v4055_v62 }
 0x126   : > { %3580 = vmatprep.subr.bf16.mxu0 %v4058_v50  ;;  %3419 = vmatpush3.bf16.msra.mxu1 %v4057_v0 }
 0x127   : > { %3397 = vmatmul.mubr.bf16.gmra.mrb[12].mxu1 %v4833_v13  ;;  %3420 = vmatprep.subr.bf16.mxu1 %v4059_v55 }
 0x128   : > { %3557 = vmatmul.mubr.bf16.gmra.mrb[12].mxu0 %v5052_v60  ;;  %3400 = vmatprep.mubr.bf16.mxu1 %v4827_v38  ;;  %v1893_v38 = vrot.slane %v4852_v4, 1  ;;  %v4065_v4 = vld [vmem:[#allocation4 + $0x210] sm:$0xff]  }
 0x129   : > { %3560 = vmatprep.mubr.bf16.mxu0 %v5055_v35  ;;  %3581 = vmatpush3.bf16.msra.mxu0 %v4058_v50 }
 0x12a   : > { %3421 = vmatpush3.bf16.msra.mxu1 %v4059_v55  ;;  %3582 = vmatprep.subr.bf16.mxu0 %v4061_v59  ;;  %v1894_v13 = vsel %vm1869_vm1, %v4977_v33, %v1893_v38  ;;  %v4066_v33 = vld [vmem:[#allocation4 + $0x218] sm:$0xff]  }
 0x12b   : > { %3422 = vmatprep.subr.bf16.mxu1 %v4062_v8 }
 0x12d   : > { %3583 = vmatpush3.bf16.msra.mxu0 %v4061_v59 }
 0x12e   : > { %3423 = vmatpush3.bf16.msra.mxu1 %v4062_v8  ;;  %3608 = vmatprep.subr.bf16.mxu0 %v4063_v58 }
 0x12f   : > { %3401 = vmatmul.mubr.bf16.gmra.mrb[16].mxu1 %v4920_v3  ;;  %3648 = vmatprep.subr.bf16.mxu1 %v4063_v58 }
 0x130   : > { %3561 = vmatmul.mubr.bf16.gmra.mrb[16].mxu0 %v5063_v11  ;;  %3404 = vmatprep.mubr.bf16.mxu1 %v4971_v7 }
 0x131   : > { %3564 = vmatprep.mubr.bf16.mxu0 %v5067_v10 }
 0x137   : > { %3405 = vmatmul.mubr.bf16.gmra.mrb[20].mxu1 %v4981_v39 }
 0x138   : > { %3565 = vmatmul.mubr.bf16.gmra.mrb[20].mxu0 %v1894_v13  ;;  %3424 = vmatprep.mubr.bf16.mxu1 %v4873_v61  ;;  %v4067_v61 = vld [vmem:[#allocation4 + $0x220] sm:$0xff]  }
 0x139   : > { %3584 = vmatprep.mubr.bf16.mxu0 %v4878_v45  ;;  %v4068_v45 = vld [vmem:[#allocation4 + $0x228] sm:$0xff]  }
 0x13f   : > { %3425 = vmatmul.mubr.bf16.vlgmr.msra.gmra.mrb[0].mxu1 %v4894_v5 }
 0x140   : > { %3585 = vmatmul.mubr.bf16.vlgmr.msra.gmra.mrb[0].mxu0 %v4881_v47  ;;  %3428 = vmatprep.mubr.bf16.mxu1 %v4911_v54 }
 0x141   : > { %3609 = vmatpush3.bf16.msra.mxu0 %v4063_v58  ;;  %3588 = vmatprep.mubr.bf16.mxu0 %v4897_v40 }
 0x142   : > { %3610 = vmatprep.subr.bf16.mxu0 %v4064_v36  ;;  %3656 = vmatpush3.bf16.msra.mxu1 %v4063_v58 }
 0x143   : > { %3649 = vmatprep.subr.bf16.mxu1 %v4064_v36 }
 0x145   : > { %3611 = vmatpush3.bf16.msra.mxu0 %v4064_v36 }
 0x146   : > { %3612 = vmatprep.subr.bf16.mxu0 %v4065_v4  ;;  %3657 = vmatpush3.bf16.msra.mxu1 %v4064_v36 }
 0x147   : > { %3429 = vmatmul.mubr.bf16.gmra.mrb[4].mxu1 %v4814_v27  ;;  %3650 = vmatprep.subr.bf16.mxu1 %v4065_v4  ;;  %v4069_v27 = vld [vmem:[#allocation4 + $0x230] sm:$0xff]  }
 0x148   : > { %3589 = vmatmul.mubr.bf16.gmra.mrb[4].mxu0 %v4901_v17  ;;  %3432 = vmatprep.mubr.bf16.mxu1 %v4847_v12  ;;  %v4070_v12 = vld [vmem:[#allocation4 + $0x238] sm:$0xff]  }
 0x149   : > { %3613 = vmatpush3.bf16.msra.mxu0 %v4065_v4  ;;  %3592 = vmatprep.mubr.bf16.mxu0 %v4904_v14 }
 0x14a   : > { %3614 = vmatprep.subr.bf16.mxu0 %v4066_v33  ;;  %3658 = vmatpush3.bf16.msra.mxu1 %v4065_v4 }
 0x14b   : > { %3651 = vmatprep.subr.bf16.mxu1 %v4066_v33 }
 0x14d   : > { %3615 = vmatpush3.bf16.msra.mxu0 %v4066_v33 }
 0x14e   : > { %3616 = vmatprep.subr.bf16.mxu0 %v4067_v61  ;;  %3659 = vmatpush3.bf16.msra.mxu1 %v4066_v33 }
 0x14f   : > { %3433 = vmatmul.mubr.bf16.gmra.mrb[8].mxu1 %v4855_v6  ;;  %3652 = vmatprep.subr.bf16.mxu1 %v4067_v61  ;;  %v2350_v6 = vrot.slane %v4971_v7, 1 }
 0x150   : > { %3593 = vmatmul.mubr.bf16.gmra.mrb[8].mxu0 %v4914_v1  ;;  %3436 = vmatprep.mubr.bf16.mxu1 %v4885_v53 }
 0x151   : > { %3596 = vmatprep.mubr.bf16.mxu0 %v4923_v30  ;;  %3617 = vmatpush3.bf16.msra.mxu0 %v4067_v61  ;;  %v2351_v47 = vsel %vm1869_vm1, %v2348_v31, %v2350_v6  ;;  %v2353_v53 = vsel %vm1869_vm1, %v2350_v6, %v2352_v51 }
 0x152   : > { %3618 = vmatprep.subr.bf16.mxu0 %v4068_v45  ;;  %3660 = vmatpush3.bf16.msra.mxu1 %v4067_v61 }
 0x153   : > { %3653 = vmatprep.subr.bf16.mxu1 %v4068_v45 }
 0x155   : > { %3619 = vmatpush3.bf16.msra.mxu0 %v4068_v45 }
 0x156   : > { %3620 = vmatprep.subr.bf16.mxu0 %v4069_v27  ;;  %3661 = vmatpush3.bf16.msra.mxu1 %v4068_v45 }
 0x157   : > { %3437 = vmatmul.mubr.bf16.gmra.mrb[12].mxu1 %v4889_v28  ;;  %3654 = vmatprep.subr.bf16.mxu1 %v4069_v27 }
 0x158   : > { %3597 = vmatmul.mubr.bf16.gmra.mrb[12].mxu0 %v4926_v25  ;;  %3440 = vmatprep.mubr.bf16.mxu1 %v4961_v16 }
 0x159   : > { %3600 = vmatprep.mubr.bf16.mxu0 %v4932_v37  ;;  %3621 = vmatpush3.bf16.msra.mxu0 %v4069_v27 }
 0x15a   : > { %3662 = vmatpush3.bf16.msra.mxu1 %v4069_v27  ;;  %3622 = vmatprep.subr.bf16.mxu0 %v4070_v12 }
 0x15b   : > { %3655 = vmatprep.subr.bf16.mxu1 %v4070_v12 }
 0x15d   : > { %3623 = vmatpush3.bf16.msra.mxu0 %v4070_v12 }
 0x15e   : > { %3663 = vmatpush3.bf16.msra.mxu1 %v4070_v12 }
 0x15f   : > { %3441 = vmatmul.mubr.bf16.gmra.mrb[16].mxu1 %v4965_v23 }
 0x160   : > { %3601 = vmatmul.mubr.bf16.gmra.mrb[16].mxu0 %v4947_v2  ;;  %3444 = vmatprep.mubr.bf16.mxu1 %v4992_v21 }
 0x161   : > { %3604 = vmatprep.mubr.bf16.mxu0 %v4951_v41 }
 0x167   : > { %3445 = vmatmul.mubr.bf16.gmra.mrb[20].mxu1 %v4957_v56 }
 0x168   : > { %3605 = vmatmul.mubr.bf16.gmra.mrb[20].mxu0 %v4954_v43  ;;  %3636 = vmatprep.mubr.bf16.mxu1 %v5063_v11 }
 0x169   : > { %3624 = vmatprep.mubr.bf16.mxu0 %v5028_v49 }
 0x16f   : > { %3637 = vmatmul.mubr.bf16.vlgmr.msra.gmra.mrb[24].mxu1 %v5067_v10 }
 0x170   : > { %3625 = vmatmul.mubr.bf16.vlgmr.msra.gmra.mrb[0].mxu0 %v5031_v63  ;;  %3640 = vmatprep.mubr.bf16.mxu1 %v4987_v9 }
 0x171   : > { %3628 = vmatprep.mubr.bf16.mxu0 %v5040_v44 }
 0x177   : > { %3641 = vmatmul.mubr.bf16.gmra.mrb[28].mxu1 %v2351_v47 }
 0x178   : > { %3629 = vmatmul.mubr.bf16.gmra.mrb[4].mxu0 %v5043_v57  ;;  %3644 = vmatprep.mubr.bf16.mxu1 %v2353_v53 }
 0x179   : > { %3632 = vmatprep.mubr.bf16.mxu0 %v5052_v60 }
 0x17f   : > { %3645 = vmatmul.mubr.bf16.gmra.mrb[32].mxu1 %v5010_v46 }
 0x180   : > { %3633 = vmatmul.mubr.bf16.gmra.mrb[8].mxu0 %v5055_v35 }
 0x212   : > { %v3426_v28 = vpop.f32.mrb[0].mxu1 }
 0x213   : > { %v1196_v5 = vpop.f32.mrb[1].mxu1 }
 0x214   : > { %v3427_v40 = vpop.f32.mrb[2].mxu1 }
 0x215   : > { %v1199_v17 = vpop.f32.mrb[3].mxu1 }
 0x21a   : > { %v5118_v14 = vpop.f32.mrb[4].mxu1 }
 0x21b   : > { %v5120_v54 = vpop.f32.mrb[5].mxu1 }
 0x21c   : > { %v5122_v1 = vpop.f32.mrb[6].mxu1 }
 0x21d   : > { %v1214_v3 = vpop.f32.mrb[7].mxu1 }
 0x222   : > { %v5124_v30 = vpop.f32.mrb[8].mxu1 }
 0x223   : > { %v1226_v25 = vpop.f32.mrb[9].mxu1 }
 0x224   : > { %v3435_v37 = vpop.f32.mrb[10].mxu1 }
 0x225   : > { %v5126_v2 = vpop.f32.mrb[11].mxu1 }
 0x22a   : > { %v3438_v41 = vpop.f32.mrb[12].mxu1 }
 0x22b   : > { %v3598_v43 = vpop.f32.mrb[12].mxu0  ;;  %v1240_v56 = vpop.f32.mrb[13].mxu1 }
 0x22c   : > { %v2272_v16 = vpop.f32.mrb[13].mxu0  ;;  %v3439_v23 = vpop.f32.mrb[14].mxu1 }
 0x22d   : > { %v3672_v7 = vadd.f32 %v2272_v16, %v1240_v56  ;;  %v3599_v31 = vpop.f32.mrb[14].mxu0  ;;  %v1243_v39 = vpop.f32.mrb[15].mxu1 }
 0x22e   : > { %v3674_v9 = vadd.f32 %v3599_v31, %v3439_v23  ;;  %v2275_v21 = vpop.f32.mrb[15].mxu0 }
 0x22f   : > { %v3676_v51 = vadd.f32 %v2275_v21, %v1243_v39 }
 0x232   : > { %v3442_v46 = vpop.f32.mrb[16].mxu1 }
 0x233   : > { %v3602_v18 = vpop.f32.mrb[16].mxu0  ;;  %v1255_v15 = vpop.f32.mrb[17].mxu1 }
 0x234   : > { %v3678_v20 = vadd.f32 %v3602_v18, %v3442_v46  ;;  %v2287_v24 = vpop.f32.mrb[17].mxu0  ;;  %v3443_v49 = vpop.f32.mrb[18].mxu1 }
 0x235   : > { %v3680_v63 = vadd.f32 %v2287_v24, %v1255_v15  ;;  %v3603_v32 = vpop.f32.mrb[18].mxu0  ;;  %v1258_v42 = vpop.f32.mrb[19].mxu1 }
 0x236   : > { %v3682_v26 = vadd.f32 %v3603_v32, %v3443_v49  ;;  %v2290_v52 = vpop.f32.mrb[19].mxu0 }
 0x23a   : > { %v3446_v19 = vpop.f32.mrb[20].mxu1 }
 0x23b   : > { %v3606_v48 = vpop.f32.mrb[20].mxu0  ;;  %v1270_v44 = vpop.f32.mrb[21].mxu1 }
 0x23c   : > { %v5128_v57 = vadd.f32 %v3606_v48, %v3446_v19  ;;  %v2302_v62 = vpop.f32.mrb[21].mxu0  ;;  %v3447_v0 = vpop.f32.mrb[22].mxu1 }
 0x23d   : > { %v3607_v29 = vpop.f32.mrb[22].mxu0  ;;  %v1272_v34 = vpop.f32.mrb[23].mxu1 }
 0x23e   : > { %v2304_v50 = vpop.f32.mrb[23].mxu0 }
 0x23f   : > { %v5130_v55 = vadd.f32 %v2304_v50, %v1272_v34 }
 0x242   : > { %v3638_v60 = vpop.f32.mrb[24].mxu1 }
 0x243   : > { %v3626_v35 = vpop.f32.mrb[0].mxu0  ;;  %v2486_v59 = vpop.f32.mrb[25].mxu1 }
 0x244   : > { %v2442_v8 = vpop.f32.mrb[1].mxu0  ;;  %v5132_v22 = vadd.f32 %v3672_v7, %v2486_v59  ;;  %v3639_v58 = vpop.f32.mrb[26].mxu1 }
 0x245   : > { %v3664_v11 = vadd.f32 %v2442_v8, %v1196_v5  ;;  %v3627_v10 = vpop.f32.mrb[2].mxu0  ;;  %v5134_v38 = vadd.f32 %v3674_v9, %v3639_v58  ;;  %v2489_v13 = vpop.f32.mrb[27].mxu1 }
 0x246   : > { %v3665_v36 = vadd.f32 %v3627_v10, %v3427_v40  ;;  %v2445_v4 = vpop.f32.mrb[3].mxu0  ;;  %v5136_v33 = vadd.f32 %v3676_v51, %v2489_v13 }
 0x247   : > { %v3666_v61 = vadd.f32 %v2445_v4, %v1199_v17  ;;  %v2650_v27 = vmul.f32 %v3664_v11, %v3664_v11 }
 0x248   : > { %v3084_v45 = vpack.c.bf16 %v5136_v33, %v5132_v22  ;;  %v2652_v28 = vmul.f32 %v3665_v36, %v3665_v36 }
 0x249   : > { %v3064_v12 = vpack.c.bf16 %v3666_v61, %v3664_v11  ;;  %v2626_v6 = vadd.f32 %v3666_v61, %v3664_v11  ;;  %v2651_v47 = vmul.f32 %v3666_v61, %v3666_v61 }
 0x24a   : > { %3104 = vst [vmem:[%s4532_s11 + $0x20] sm:$0xff] %v3084_v45   ;;  %v3642_v53 = vpop.f32.mrb[28].mxu1 }
 0x24b   : > { %3065 = vst [vmem:[%s4532_s11] sm:$0xff] %v3064_v12   ;;  %v2666_v5 = vadd.f32 %v2651_v47, %v2650_v27  ;;  %v3630_v3 = vpop.f32.mrb[4].mxu0  ;;  %v5142_v25 = vadd.f32 %v3678_v20, %v3642_v53  ;;  %v2627_v40 = vadd.f32 %v3665_v36, %v2626_v6  ;;  %v2501_v37 = vpop.f32.mrb[29].mxu1 }
 0x24c   : > { %v3667_v41 = vadd.f32 %v3630_v3, %v5118_v14  ;;  %v2457_v17 = vpop.f32.mrb[5].mxu0  ;;  %v5145_v43 = vadd.f32 %v3680_v63, %v2501_v37  ;;  %v3643_v56 = vpop.f32.mrb[30].mxu1 }
 0x24d   : > { %v3668_v16 = vadd.f32 %v2457_v17, %v5120_v54  ;;  %v2667_v23 = vadd.f32 %v2666_v5, %v2652_v28  ;;  %v3631_v7 = vpop.f32.mrb[6].mxu0  ;;  %v5148_v31 = vadd.f32 %v3682_v26, %v3643_v56  ;;  %v2504_v39 = vpop.f32.mrb[31].mxu1 }
 0x24e   : > { %v3089_v9 = vpack.c.bf16 %v5145_v43, %v5134_v38  ;;  %v3669_v14 = vadd.f32 %v3631_v7, %v5122_v1  ;;  %v2460_v21 = vpop.f32.mrb[7].mxu0  ;;  %v2654_v20 = vmul.f32 %v3667_v41, %v3667_v41 }
 0x24f   : > { %v3069_v51 = vpack.c.bf16 %v3668_v16, %v3665_v36  ;;  %v2628_v46 = vadd.f32 %v3668_v16, %v2627_v40  ;;  %v2653_v18 = vmul.f32 %v3668_v16, %v3668_v16  ;;  %v3094_v54 = vpack.c.bf16 %v5148_v31, %v5142_v25 }
 0x250   : > { %3105 = vst [vmem:[%s4532_s11 + $0x28] sm:$0xff] %v3089_v9   ;;  %v3074_v15 = vpack.c.bf16 %v3669_v14, %v3667_v41  ;;  %v2655_v32 = vmul.f32 %v3669_v14, %v3669_v14 }
 0x251   : > { %3101 = vst [vmem:[%s4532_s11 + $0x8] sm:$0xff] %v3069_v51   ;;  %v2668_v24 = vadd.f32 %v2667_v23, %v2653_v18  ;;  %v2629_v49 = vadd.f32 %v3667_v41, %v2628_v46  ;;  %3106 = vst [vmem:[%s4532_s11 + $0x30] sm:$0xff] %v3094_v54  }
 0x252   : > { %3102 = vst [vmem:[%s4532_s11 + $0x10] sm:$0xff] %v3074_v15   ;;  %v3646_v63 = vpop.f32.mrb[32].mxu1 }
 0x253   : > { %v2630_v1 = vadd.f32 %v3669_v14, %v2629_v49  ;;  %v2669_v42 = vadd.f32 %v2668_v24, %v2654_v20  ;;  %v3634_v26 = vpop.f32.mrb[8].mxu0  ;;  %v5162_v52 = vadd.f32 %v5128_v57, %v3646_v63  ;;  %v2516_v19 = vpop.f32.mrb[33].mxu1 }
 0x254   : > { %v3670_v48 = vadd.f32 %v3634_v26, %v5124_v30  ;;  %v2472_v44 = vpop.f32.mrb[9].mxu0  ;;  %v3647_v62 = vpop.f32.mrb[34].mxu1 }
 0x255   : > { %v2670_v0 = vadd.f32 %v2669_v42, %v2655_v32  ;;  %v3635_v29 = vpop.f32.mrb[10].mxu0  ;;  %v2518_v34 = vpop.f32.mrb[35].mxu1 }
 0x256   : > { %v2474_v50 = vpop.f32.mrb[11].mxu0  ;;  %v3687_v60 = vadd.f32 %v5130_v55, %v2518_v34  ;;  %v2657_v55 = vmul.f32 %v3670_v48, %v3670_v48 }
 0x257   : > { %v3671_v57 = vadd.f32 %v2474_v50, %v5126_v2 }
 0x258   : > { %v3099_v35 = vpack.c.bf16 %v5162_v52, %v3687_v60 }
 0x259   : > { %v3079_v30 = vpack.c.bf16 %v3670_v48, %v3671_v57  ;;  %v2631_v59 = vadd.f32 %v3671_v57, %v2630_v1  ;;  %v2656_v8 = vmul.f32 %v3671_v57, %v3671_v57 }
 0x25a   : > { %3107 = vst [vmem:[%s4532_s11 + $0x38] sm:$0xff] %v3099_v35  }
 0x25b   : > { %3103 = vst [vmem:[%s4532_s11 + $0x18] sm:$0xff] %v3079_v30   ;;  %v2632_v58 = vadd.f32 %v3670_v48, %v2631_v59  ;;  %v2671_v2 = vadd.f32 %v2670_v0, %v2656_v8 }
 0x25c   : > { %4165 = shalt.err (!%p4162_p6)
}
 0x25d   : > { %s4166_s11 = scalar_lea.hbm %s5172_s29, 1024  ;;  %s4170_s7 = scalar_lea.hbm %s5336_s2, 4096 }
 0x25e   : > { %p4167_p10 = scmp.ne.s32.totalorder %s5172_s29, %s4166_s11  ;;  %p4171_p12 = scmp.lt.u32.totalorder %s5172_s29, %s5336_s2 }
 0x25f   : > { %p4172_p13 = scmp.lt.u32.totalorder %s4170_s7, %s4166_s11  ;;  %p4174_p7 = scmp.lt.u32.totalorder %s4166_s11, %s5172_s29 }
 0x260   : > { %p4168_p4 = pnand %p4167_p10, %p5379_p5 }
 0x261   : > { %p4173_p8 = por %p4172_p13, %p4171_p12 }
 0x262   : > { %p4169_p3 = pneg %p4168_p4 }
 0x263   : > { %p4175_p9 = por %p4174_p7, %p4173_p8 }
 0x265   : > { %p4176_p11 = pnand %p4175_p9, %p4169_p3 }
 0x267   : > { %4179 = shalt.err (!%p4176_p11)
}
 0x268   : > { %s4345_s8 = smov 64   ;;  %s4346_s21 = smov 4   ;;  %v2658_v11 = vmul.f32 %v5132_v22, %v5132_v22  ;;  %v2633_v10 = vadd.f32 %v5132_v22, %v2632_v58  ;;  %v2672_v13 = vadd.f32 %v2671_v2, %v2657_v55  ;;  %v2659_v36 = vmul.f32 %v5136_v33, %v5136_v33  ;;  %v2625_v46 = vld [vmem:[%s4534_s5] sm:$0x1] }
 0x269   : > { %3850 = dma.vmem_to_hbm [thread:$0]  (%p5379_p5), %s5174_s1, 1024, %s5172_s29, %s5180_s28, %s4345_s8, %s4345_s8, %s4346_s21   ;;  %v2660_v45 = vmul.f32 %v5134_v38, %v5134_v38  ;;  %v2661_v6 = vmul.f32 %v5145_v43, %v5145_v43  ;;  %v2662_v22 = vmul.f32 %v5142_v25, %v5142_v25  ;;  %v2665_v17 = vmul.f32 %v5162_v52, %v5162_v52 }
 0x26a   : > { %v2634_v4 = vadd.f32 %v5136_v33, %v2633_v10  ;;  %v2673_v61 = vadd.f32 %v2672_v13, %v2658_v11  ;;  %v2663_v33 = vmul.f32 %v5148_v31, %v5148_v31  ;;  %s2694_s6 = sand.u32 1, %s4430_s26   ;;  %s3035_s1 = sshll.u32 %s4324_s22, 4  ;;  %v2649_v15 = vld [vmem:[%s4536_s10] sm:$0x1] }
 0x26b   : > { %s2730_s24 = sshll.u32 %s4534_s5, 4  ;;  %s2743_s23 = sshll.u32 %s4536_s10, 4  ;;  %s5236_s24 = int_to_ptr.vmem [resolvable:$true] %s2730_s24  ;;  %s5244_s23 = int_to_ptr.vmem [resolvable:$true] %s2743_s23 }
 0x26c   : > { %v2674_v27 = vadd.f32 %v2673_v61, %v2659_v36  ;;  %v2635_v12 = vadd.f32 %v5134_v38, %v2634_v4  ;;  %v2664_v38 = vmul.f32 %v3687_v60, %v3687_v60  ;;  %s5234_s28 = scalar_lea.hbm %s5337_s3, %s3035_s1  ;;  %s5242_s16 = scalar_lea.hbm %s5338_s4, %s3035_s1 }
 0x26d   : > { %s5246_s15 = scalar_lea.sflag [#allocation9], %s2694_s6  ;;  %s4180_s20 = scalar_lea.vmem %s5236_s24, 16 }
 0x26e   : > { %v2636_v47 = vadd.f32 %v5145_v43, %v2635_v12  ;;  %v2675_v53 = vadd.f32 %v2674_v27, %v2660_v45  ;;  %p4181_p5 = scmp.ne.s32.totalorder %s5236_s24, %s4180_s20  ;;  %p5380_p0 = scmp.ne.s32.totalorder %s5366_s12, 0 }
 0x26f   : > { %s4347_s30 = smov [#allocation8]  }
 0x270   : > { %v2637_v28 = vadd.f32 %v5142_v25, %v2636_v47  ;;  %v2676_v5 = vadd.f32 %v2675_v53, %v2661_v6  ;;  %p4182_p1 = pnand %p4181_p5, %p5380_p0  ;;  %s4184_s11 = sshll.u32 %s4347_s30, 4  ;;  %s4185_s11 = int_to_ptr.vmem [resolvable:$false] %s4184_s11 }
 0x271   : > { %s4186_s13 = scalar_lea.vmem %s4185_s11, 32  ;;  %p4187_p6 = scmp.lt.s32.totalorder %s5236_s24, %s4185_s11 }
 0x272   : > { %v2638_v3 = vadd.f32 %v5148_v31, %v2637_v28  ;;  %v2677_v40 = vadd.f32 %v2676_v5, %v2662_v22  ;;  %p4183_p2 = pneg %p4182_p1  ;;  %p4188_p10 = scmp.lt.s32.totalorder %s4186_s13, %s4180_s20 }
 0x274   : > { %v2639_v37 = vadd.f32 %v3687_v60, %v2638_v3  ;;  %v2678_v41 = vadd.f32 %v2677_v40, %v2663_v33  ;;  %p4189_p4 = por %p4188_p10, %p4187_p6 }
 0x276   : > { %v2640_v43 = vadd.f32 %v5162_v52, %v2639_v37  ;;  %v2679_v25 = vadd.f32 %v2678_v41, %v2664_v38  ;;  %p4190_p3 = pnand %p4189_p4, %p4183_p2 }
 0x278   : > { %v2641_v56 = vrot.slane %v2640_v43, 4  ;;  %v2680_v16 = vadd.f32 %v2679_v25, %v2665_v17 }
 0x27a   : > { %v2642_v23 = vadd.f32 %v2641_v56, %v2640_v43  ;;  %v2681_v7 = vrot.slane %v2680_v16, 4 }
 0x27c   : > { %v2643_v31 = vrot.slane %v2642_v23, 2  ;;  %v2682_v39 = vadd.f32 %v2681_v7, %v2680_v16 }
 0x27e   : > { %v2644_v9 = vadd.f32 %v2643_v31, %v2642_v23  ;;  %v2683_v14 = vrot.slane %v2682_v39, 2 }
 0x280   : > { %v2684_v21 = vadd.f32 %v2683_v14, %v2682_v39  ;;  %v2645_v51 = vrot.slane %v2644_v9, 1 }
 0x282   : > { %v2685_v18 = vrot.slane %v2684_v21, 1  ;;  %v2646_v54 = vadd.f32 %v2645_v51, %v2644_v9 }
 0x284   : > { %v2647_v20 = vadd.f32 %v2646_v54, %v2625_v46  ;;  %v2686_v24 = vadd.f32 %v2685_v18, %v2684_v21 }
 0x286   : > { %2648 = vst [vmem:[%s4534_s5] sm:$0x1] %v2647_v20  ;;  %v2687_v49 = vadd.f32 %v2686_v24, %v2649_v15 }
 0x287   : > { %4193 = shalt.err (!%p4190_p3)
}
 0x288   : > { %s4194_s5 = scalar_lea.hbm %s5234_s28, 16  ;;  %s4198_s27 = scalar_lea.hbm %s5337_s3, 32 }
 0x289   : > { %p4195_p12 = scmp.ne.s32.totalorder %s5234_s28, %s4194_s5  ;;  %p4199_p7 = scmp.lt.u32.totalorder %s5234_s28, %s5337_s3 }
 0x28a   : > { %p4200_p9 = scmp.lt.u32.totalorder %s4198_s27, %s4194_s5  ;;  %p4202_p5 = scmp.lt.u32.totalorder %s4194_s5, %s5234_s28 }
 0x28b   : > { %p4196_p13 = pnand %p4195_p12, %p5380_p0 }
 0x28c   : > { %p4201_p11 = por %p4200_p9, %p4199_p7 }
 0x28d   : > { %p4197_p8 = pneg %p4196_p13 }
 0x28e   : > { %p4203_p1 = por %p4202_p5, %p4201_p11 }
 0x290   : > { %p4204_p2 = pnand %p4203_p1, %p4197_p8 }
 0x292   : > { %4207 = shalt.err (!%p4204_p2)
}
 0x293   : > { %3851 = dma.vmem_to_hbm [thread:$0]  (%p5380_p0), %s5236_s24, 16, %s5234_s28, %s5246_s15   ;;  %2688 = vst [vmem:[%s4536_s10] sm:$0x1] %v2687_v49 }
 0x294   : > { %s4208_s21 = scalar_lea.vmem %s5244_s23, 16  ;;  %s4348_s6 = smov [#allocation10]  }
 0x295   : > { %p4209_p6 = scmp.ne.s32.totalorder %s5244_s23, %s4208_s21  ;;  %s4212_s1 = sshll.u32 %s4348_s6, 4  ;;  %s4213_s1 = int_to_ptr.vmem [resolvable:$false] %s4212_s1 }
 0x296   : > { %s4214_s29 = scalar_lea.vmem %s4213_s1, 32  ;;  %p4215_p3 = scmp.lt.s32.totalorder %s5244_s23, %s4213_s1 }
 0x297   : > { %p4210_p10 = pnand %p4209_p6, %p5380_p0  ;;  %p4216_p12 = scmp.lt.s32.totalorder %s4214_s29, %s4208_s21 }
 0x299   : > { %p4211_p4 = pneg %p4210_p10  ;;  %p4217_p13 = por %p4216_p12, %p4215_p3 }
 0x29b   : > { %p4218_p8 = pnand %p4217_p13, %p4211_p4 }
 0x29d   : > { %4221 = shalt.err (!%p4218_p8)
}
 0x29e   : > { %s4222_s10 = scalar_lea.hbm %s5242_s16, 16  ;;  %s4226_s28 = scalar_lea.hbm %s5338_s4, 32 }
 0x29f   : > { %p4223_p7 = scmp.ne.s32.totalorder %s5242_s16, %s4222_s10  ;;  %p4227_p5 = scmp.lt.u32.totalorder %s5242_s16, %s5338_s4 }
 0x2a0   : > { %p4228_p1 = scmp.lt.u32.totalorder %s4226_s28, %s4222_s10  ;;  %p4230_p6 = scmp.lt.u32.totalorder %s4222_s10, %s5242_s16 }
 0x2a1   : > { %p4224_p9 = pnand %p4223_p7, %p5380_p0 }
 0x2a2   : > { %p4229_p2 = por %p4228_p1, %p4227_p5 }
 0x2a3   : > { %p4225_p11 = pneg %p4224_p9 }
 0x2a4   : > { %p4231_p10 = por %p4230_p6, %p4229_p2 }
 0x2a6   : > { %p4232_p4 = pnand %p4231_p10, %p4225_p11 }
 0x2a8   : > { %4235 = shalt.err (!%p4232_p4)
}
 0x2a9   : > { %3852 = dma.vmem_to_hbm [thread:$0]  (%p5380_p0), %s5244_s23, 16, %s5242_s16, %s5246_s15  }
 0x2aa PF: > { %s5381_s20 = sld [smem:[#allocation28_spill]]  ;;  %p3873_p3 = scmp.ge.s32.totalorder %s4336_s25, 2 }
 0x2ab   : > { %s2755_s30 = sand.u32 1, %s4308_s18  }
 0x2ac   : > { %s2756_s11 = scalar_lea.sflag [#allocation6], %s2755_s30 }
 0x2b0   : > { %p5382_p12 = scmp.ne.s32.totalorder %s5381_s20, 0 }
 0x2b2   : > { %p3861_p13 = pnand %p3873_p3, %p5382_p12 }
 0x2b4   : > { %4287 = dma.done.wait (!%p3861_p13), %s2756_s11, 1024  }
 0x2b5   : > { %4289 = vsyncadd (!%p3861_p13), %s2756_s11, 4294966272  ;;  %s5383_s13 = sadd.s32 4294967294, %s4336_s25   ;;  %s5384_s5 = sld [smem:[#allocation31_spill]] }
 0x2b6   : > { %s2764_s14 = sand.u32 1, %s5383_s13  }
 0x2b7   : > { %s2765_s12 = scalar_lea.sflag [#allocation9], %s2764_s14 }
 0x2bb   : > { %p5385_p8 = scmp.ne.s32.totalorder %s5384_s5, 0 }
 0x2bd   : > { %p3864_p7 = pnand %p3873_p3, %p5385_p8 }
 0x2bf   : > { %4291 = dma.done.wait (!%p3864_p7), %s2765_s12, 32  }
 0x2c0   : > { %4293 = vsyncadd (!%p3864_p7), %s2765_s12, 4294967264  ;;  %s22_s25 = sadd.s32 1, %s4336_s25   ;;  %s5386_s15 = sld [smem:[#allocation21_spill]] }
 0x2c1   : > { %p19_p0 = scmp.ge.s32.totalorder %s22_s25, 6   ;;  %s5387_s16 = sld [smem:[#allocation22_spill]] }
 0x2c2   : > { %s5388_s17 = sld [smem:[#allocation29_spill]]  ;;  %s5389_s23 = sld [smem:[#allocation23_spill]] }
 0x2c3   : > { %s5390_s20 = sld [smem:[#allocation30_spill]]  ;;  %s5391_s21 = sld [smem:[#allocation24_spill]] }
 0x2c4   : > { %s5392_s22 = sld [smem:[#allocation25_spill]]  ;;  %s5393_s7 = sld [smem:[#allocation26_spill]] }
 0x2c5   : > { %s5394_s24 = sld [smem:[#allocation27_spill]]  ;;  %s5395_s18 = smov %s4312_s19 }
 0x2c6   :  { %21 = sbr.rel (!%p19_p0) target bundleno = 12 (0xc), region = 124 }
 0x2c8   : > { %s5396_s19 = smov %s5389_s23 }
 0x2ca   : > { %s5397_s23 = smov %s5393_s7 }
 0x2cd   :  { %2777 = vsyncpa [#allocation5], 1 }
 0x2ce   :  { %2779 = vsyncpa [#allocation5 + $0x1], 1 }
 0x2cf   :  { %2780 = vsyncpa [#allocation6], 1 }
 0x2d0   :  { %2782 = vsyncpa [#allocation6 + $0x1], 1 }
 0x2d1   :  { %2783 = vsyncpa [#allocation9], 1 }
 0x2d2   :  { %2785 = vsyncpa [#allocation9 + $0x1], 1 }
 0x2d3   :  { %2786 = vsyncmov [#allocation3] }
 0x2d6   :  { %s2787_s27 = vpop.sfrf %2786 }
 0x2d7   :  { %p3039_p9 = scmp.ne.s32.totalorder %s2787_s27, 0 }
 0x2d9   :  { %2791 = shalt.err (%p3039_p9)  }
 0x2da   :  { %2793 = vsyncmov [#allocation3 + $0x1] }
 0x2dd   :  { %s2794_s9 = vpop.sfrf %2793 }
 0x2de   :  { %p3040_p11 = scmp.ne.s32.totalorder %s2794_s9, 0 }
 0x2e0   :  { %2798 = shalt.err (%p3040_p11)  }

</bundles_post_ra>
